<compile_context>
chip_gen: v5e
topology: v5e:2x2
jax: 0.10.0
libtpu: 0.0.40
codegen_flags: <defaults>
</compile_context>

<pallas_src>
import math

import numpy as np

import jax
import jax.numpy as jnp
from jax.experimental import pallas as pl
from jax.experimental.pallas import tpu as pltpu

LANE = 128
ROW_ALIGN = 32        # multiple of the native sublane tile for f32/bf16/int8
MAX_TILE_ROWS = 4096  # hard cap on rows per grid step


def _round_up(a, b):
    return ((a + b - 1) // b) * b


def _chip_traits():
    """Best-effort chip detection: (is_v7x, mxu_has_int8). Conservative on failure."""
    try:
        kind = jax.devices()[0].device_kind.lower()
    except Exception:
        return False, False
    if "tpu" not in kind:
        return False, False
    is_v7x = "7" in kind
    mxu_has_int8 = (not is_v7x) and any(v in kind for v in ("v4", "v5", "v6"))
    return is_v7x, mxu_has_int8


def _interleave_matrix(T, dtype):
    """One-hot E with E[t*128 + lane, lane*T + t] = 1.

    Maps the planar spike-scratch layout (col = t*128 + lane) to the
    lane-interleaved output layout (col = lane*T + t).
    """
    n = T * LANE
    r = np.arange(n)
    t = r // LANE
    lane = r % LANE
    e = np.zeros((n, n), dtype=np.float32)
    e[r, lane * T + t] = 1.0
    return jnp.asarray(e, dtype=dtype)


def _make_spike_kernel(theta, T, mm_dtype, acc_dtype):
    theta = float(theta)

    def kernel(e_ref, x_ref, o_ref, s_ref):
        # e_ref: (T*128, T*128) interleave matrix (VMEM-resident, constant block)
        # x_ref: (tm, 128) input tile (original dtype)
        # o_ref: (tm, T*128) float32, column c = lane*T + t (lane-interleaved)
        # s_ref: (tm, T*128) mm_dtype scratch holding planar spike planes
        x = x_ref[...].astype(jnp.float32)
        u = jnp.zeros_like(x)
        for t in range(T):                        # T is small & static -> unrolled
            u = u + x
            s = jnp.where(u >= theta, 1.0, 0.0)   # exact f32 spikes
            u = u - s * theta
            # planar, lane-aligned, unmasked store of this spike plane
            s_ref[:, t * LANE:(t + 1) * LANE] = s.astype(mm_dtype)
        # Single MXU matmul permutes planar -> lane-interleaved.  Exact: all
        # operands are 0/1 and each output column sums exactly one term.
        acc = jnp.dot(s_ref[...], e_ref[...], preferred_element_type=acc_dtype)
        o_ref[...] = acc.astype(jnp.float32)      # o_ref written exactly once

    return kernel


def _pick_tiling(rows, T, in_bytes, mm_bytes, is_v7x, known_chip):
    # Per-row VMEM bytes per grid step:
    #   2x input double-buffer + 2x f32 output double-buffer
    #   + mm_dtype spike scratch + f32 matmul intermediate (headroom).
    per_row = (2 * LANE * in_bytes
               + 2 * T * LANE * 4
               + T * LANE * mm_bytes
               + T * LANE * 4)
    e_bytes = (T * LANE) * (T * LANE) * mm_bytes        # VMEM-resident constant
    if is_v7x or not known_chip:
        vmem_limit = 48 * 1024 * 1024    # v7x has only 64 MiB physical VMEM
    else:
        vmem_limit = 64 * 1024 * 1024    # v5e / v6e have 128 MiB physical VMEM
    budget = int(vmem_limit * 0.85) - e_bytes
    max_tm = max(ROW_ALIGN, (budget // per_row) // ROW_ALIGN * ROW_ALIGN)
    max_tm = min(max_tm, MAX_TILE_ROWS)

    # v7x: 2 TensorCores -> keep >=4 parallel steps; v5e/v6e: 1 TC, >=2 steps
    # only so the output writeback of step i-1 overlaps step i's compute.
    min_steps = 4 if is_v7x else 2
    if rows < 128:                                       # trivial input
        tm = min(max_tm, _round_up(rows, ROW_ALIGN))
    else:
        steps = max(min_steps, (rows + max_tm - 1) // max_tm)
        tm = min(max_tm, _round_up((rows + steps - 1) // steps, ROW_ALIGN))
    return tm, vmem_limit


def generate_spike(x, theta=0.9999, T=5):
    """JAX/Pallas equivalent of _generate_spike.forward.

    x: any-shaped array (e.g. NCHW). Returns float32 array of shape x.shape + (T,).
    """
    orig_shape = tuple(x.shape)
    total = math.prod(orig_shape)

    is_v7x, mxu_has_int8 = _chip_traits()
    known_chip = is_v7x or mxu_has_int8
    if mxu_has_int8:
        mm_dtype, acc_dtype, mm_bytes = jnp.int8, jnp.int32, 1     # lossless for 0/1
    else:
        mm_dtype, acc_dtype, mm_bytes = jnp.bfloat16, jnp.float32, 2

    rows = _round_up(total, LANE) // LANE
    in_bytes = jnp.asarray(x).dtype.itemsize
    tm, vmem_limit = _pick_tiling(rows, T, in_bytes, mm_bytes, is_v7x, known_chip)
    padded_rows = _round_up(rows, tm)
    padded_total = padded_rows * LANE

    x_flat = jnp.reshape(x, (-1,))
    if padded_total != total:                    # pad only the ragged tail
        x_flat = jnp.pad(x_flat, (0, padded_total - total))
    x2d = jnp.reshape(x_flat, (padded_rows, LANE))

    e_mat = _interleave_matrix(T, mm_dtype)
    grid = (padded_rows // tm,)

    out2d = pl.pallas_call(
        _make_spike_kernel(theta, T, mm_dtype, acc_dtype),
        out_shape=jax.ShapeDtypeStruct((padded_rows, T * LANE), jnp.float32),
        grid_spec=pltpu.PrefetchScalarGridSpec(
            num_scalar_prefetch=0,
            grid=grid,
            in_specs=[
                # E: constant block index -> stays VMEM-resident across steps
                pl.BlockSpec((T * LANE, T * LANE), lambda i: (0, 0)),
                pl.BlockSpec((tm, LANE), lambda i: (i, 0)),
            ],
            out_specs=pl.BlockSpec((tm, T * LANE), lambda i: (i, 0)),
            scratch_shapes=[pltpu.VMEM((tm, T * LANE), mm_dtype)],
        ),
        compiler_params=pltpu.CompilerParams(
            dimension_semantics=("parallel",),
            vmem_limit_bytes=vmem_limit,
        ),
    )(e_mat, x2d)

    # (padded_rows, T*128) with col = lane*T + t  ==  row-major (padded_total, T):
    # everything below is a free row-major reshape (no transpose anywhere).
    out = jnp.reshape(out2d, (padded_total, T))
    if padded_total != total:
        out = out[:total]
    return jnp.reshape(out, orig_shape + (T,))


def _reference(x, theta=0.9999, T=5):
    """Pure-JAX reference for correctness checking."""
    x = x.astype(jnp.float32)
    u = jnp.zeros_like(x)
    spikes = []
    for _ in range(T):
        u = u + x
        s = (u >= theta).astype(jnp.float32)
        spikes.append(s)
        u = u - s * theta
    return jnp.stack(spikes, axis=-1)


if __name__ == "__main__":
    key = jax.random.PRNGKey(0)
    x = jax.random.uniform(key, (2, 4, 16, 16), dtype=jnp.float32)

    out = jax.block_until_ready(generate_spike(x))
    ref = _reference(x)

    assert out.shape == (2, 4, 16, 16, 5), out.shape
    assert out.dtype == jnp.float32
    assert jnp.allclose(out, ref), "mismatch vs reference"

    print("KERNEL_OK")
</pallas_src>

<mosaic_0001>
module attributes {stable_mosaic.version = 11 : i64} {
  func.func @kernel(%arg0: i32, %arg1: memref<640x640xbf16, #tpu.memory_space<vmem>>, %arg2: memref<32x128xf32, #tpu.memory_space<vmem>>, %arg3: memref<32x640xf32, #tpu.memory_space<vmem>>, %arg4: memref<32x640xbf16, #tpu.memory_space<vmem>>) attributes {dimension_semantics = [#tpu.dimension_semantics<parallel>], iteration_bounds = array<i64: 1>, scalar_prefetch = 0 : i64, scratch_operands = 1 : i64, tpu.core_type = #tpu.core_type<tc>, window_params = [{pipeline_mode = #tpu.pipeline_mode<synchronous>, transform_indices = @transform_0, window_bounds = array<i64: 640, 640>}, {transform_indices = @transform_1, window_bounds = array<i64: 32, 128>}, {transform_indices = @transform_2, window_bounds = array<i64: 32, 640>}]} {
    %c0 = arith.constant 0 : index
    %c0_0 = arith.constant 0 : index
    %0 = vector.load %arg2[%c0, %c0_0] : memref<32x128xf32, #tpu.memory_space<vmem>>, vector<32x128xf32>
    %cst = arith.constant 0.000000e+00 : f32
    %1 = vector.broadcast %cst : f32 to vector<32x128xf32>
    %2 = arith.addf %1, %0 : vector<32x128xf32>
    %cst_1 = arith.constant 0.999899983 : f32
    %3 = vector.broadcast %cst_1 : f32 to vector<32x128xf32>
    %4 = arith.cmpf oge, %2, %3 : vector<32x128xf32>
    %cst_2 = arith.constant 1.000000e+00 : f32
    %cst_3 = arith.constant 0.000000e+00 : f32
    %5 = vector.broadcast %cst_2 : f32 to vector<32x128xf32>
    %6 = vector.broadcast %cst_3 : f32 to vector<32x128xf32>
    %7 = arith.select %4, %5, %6 : vector<32x128xi1>, vector<32x128xf32>
    %cst_4 = arith.constant 0.999899983 : f32
    %8 = vector.broadcast %cst_4 : f32 to vector<32x128xf32>
    %9 = arith.mulf %7, %8 : vector<32x128xf32>
    %10 = arith.subf %2, %9 : vector<32x128xf32>
    %11 = arith.truncf %7 : vector<32x128xf32> to vector<32x128xbf16>
    %c0_5 = arith.constant 0 : index
    %c0_6 = arith.constant 0 : index
    %12 = vector.load %arg4[%c0_5, %c0_6] : memref<32x640xbf16, #tpu.memory_space<vmem>>, vector<32x128xbf16>
    tpu.vector_store %arg4[%c0_5, %c0_6], %11 {strides = array<i32>} : memref<32x640xbf16, #tpu.memory_space<vmem>>, vector<32x128xbf16>,
    %13 = arith.addf %10, %0 : vector<32x128xf32>
    %cst_7 = arith.constant 0.999899983 : f32
    %14 = vector.broadcast %cst_7 : f32 to vector<32x128xf32>
    %15 = arith.cmpf oge, %13, %14 : vector<32x128xf32>
    %cst_8 = arith.constant 1.000000e+00 : f32
    %cst_9 = arith.constant 0.000000e+00 : f32
    %16 = vector.broadcast %cst_8 : f32 to vector<32x128xf32>
    %17 = vector.broadcast %cst_9 : f32 to vector<32x128xf32>
    %18 = arith.select %15, %16, %17 : vector<32x128xi1>, vector<32x128xf32>
    %cst_10 = arith.constant 0.999899983 : f32
    %19 = vector.broadcast %cst_10 : f32 to vector<32x128xf32>
    %20 = arith.mulf %18, %19 : vector<32x128xf32>
    %21 = arith.subf %13, %20 : vector<32x128xf32>
    %22 = arith.truncf %18 : vector<32x128xf32> to vector<32x128xbf16>
    %c0_11 = arith.constant 0 : index
    %c128 = arith.constant 128 : index
    %23 = vector.load %arg4[%c0_11, %c128] : memref<32x640xbf16, #tpu.memory_space<vmem>>, vector<32x128xbf16>
    tpu.vector_store %arg4[%c0_11, %c128], %22 {strides = array<i32>} : memref<32x640xbf16, #tpu.memory_space<vmem>>, vector<32x128xbf16>,
    %24 = arith.addf %21, %0 : vector<32x128xf32>
    %cst_12 = arith.constant 0.999899983 : f32
    %25 = vector.broadcast %cst_12 : f32 to vector<32x128xf32>
    %26 = arith.cmpf oge, %24, %25 : vector<32x128xf32>
    %cst_13 = arith.constant 1.000000e+00 : f32
    %cst_14 = arith.constant 0.000000e+00 : f32
    %27 = vector.broadcast %cst_13 : f32 to vector<32x128xf32>
    %28 = vector.broadcast %cst_14 : f32 to vector<32x128xf32>
    %29 = arith.select %26, %27, %28 : vector<32x128xi1>, vector<32x128xf32>
    %cst_15 = arith.constant 0.999899983 : f32
    %30 = vector.broadcast %cst_15 : f32 to vector<32x128xf32>
    %31 = arith.mulf %29, %30 : vector<32x128xf32>
    %32 = arith.subf %24, %31 : vector<32x128xf32>
    %33 = arith.truncf %29 : vector<32x128xf32> to vector<32x128xbf16>
    %c0_16 = arith.constant 0 : index
    %c256 = arith.constant 256 : index
    %34 = vector.load %arg4[%c0_16, %c256] : memref<32x640xbf16, #tpu.memory_space<vmem>>, vector<32x128xbf16>
    tpu.vector_store %arg4[%c0_16, %c256], %33 {strides = array<i32>} : memref<32x640xbf16, #tpu.memory_space<vmem>>, vector<32x128xbf16>,
    %35 = arith.addf %32, %0 : vector<32x128xf32>
    %cst_17 = arith.constant 0.999899983 : f32
    %36 = vector.broadcast %cst_17 : f32 to vector<32x128xf32>
    %37 = arith.cmpf oge, %35, %36 : vector<32x128xf32>
    %cst_18 = arith.constant 1.000000e+00 : f32
    %cst_19 = arith.constant 0.000000e+00 : f32
    %38 = vector.broadcast %cst_18 : f32 to vector<32x128xf32>
    %39 = vector.broadcast %cst_19 : f32 to vector<32x128xf32>
    %40 = arith.select %37, %38, %39 : vector<32x128xi1>, vector<32x128xf32>
    %cst_20 = arith.constant 0.999899983 : f32
    %41 = vector.broadcast %cst_20 : f32 to vector<32x128xf32>
    %42 = arith.mulf %40, %41 : vector<32x128xf32>
    %43 = arith.subf %35, %42 : vector<32x128xf32>
    %44 = arith.truncf %40 : vector<32x128xf32> to vector<32x128xbf16>
    %c0_21 = arith.constant 0 : index
    %c384 = arith.constant 384 : index
    %45 = vector.load %arg4[%c0_21, %c384] : memref<32x640xbf16, #tpu.memory_space<vmem>>, vector<32x128xbf16>
    tpu.vector_store %arg4[%c0_21, %c384], %44 {strides = array<i32>} : memref<32x640xbf16, #tpu.memory_space<vmem>>, vector<32x128xbf16>,
    %46 = arith.addf %43, %0 : vector<32x128xf32>
    %cst_22 = arith.constant 0.999899983 : f32
    %47 = vector.broadcast %cst_22 : f32 to vector<32x128xf32>
    %48 = arith.cmpf oge, %46, %47 : vector<32x128xf32>
    %cst_23 = arith.constant 1.000000e+00 : f32
    %cst_24 = arith.constant 0.000000e+00 : f32
    %49 = vector.broadcast %cst_23 : f32 to vector<32x128xf32>
    %50 = vector.broadcast %cst_24 : f32 to vector<32x128xf32>
    %51 = arith.select %48, %49, %50 : vector<32x128xi1>, vector<32x128xf32>
    %52 = arith.truncf %51 : vector<32x128xf32> to vector<32x128xbf16>
    %c0_25 = arith.constant 0 : index
    %c512 = arith.constant 512 : index
    %53 = vector.load %arg4[%c0_25, %c512] : memref<32x640xbf16, #tpu.memory_space<vmem>>, vector<32x128xbf16>
    tpu.vector_store %arg4[%c0_25, %c512], %52 {strides = array<i32>} : memref<32x640xbf16, #tpu.memory_space<vmem>>, vector<32x128xbf16>,
    %c0_26 = arith.constant 0 : index
    %c0_27 = arith.constant 0 : index
    %54 = vector.load %arg4[%c0_26, %c0_27] : memref<32x640xbf16, #tpu.memory_space<vmem>>, vector<32x640xbf16>
    %c0_28 = arith.constant 0 : index
    %c0_29 = arith.constant 0 : index
    %55 = vector.load %arg1[%c0_28, %c0_29] : memref<640x640xbf16, #tpu.memory_space<vmem>>, vector<640x640xbf16>
    %cst_30 = arith.constant dense<0.000000e+00> : vector<32x640xf32>
    %56 = tpu.matmul %54, %55, %cst_30 {dimension_numbers = #tpu.dot_dimension_numbers<[1], [0], [0], [1], [0, 0, 1, 1], [], []>} : vector<32x640xbf16>, vector<640x640xbf16>, vector<32x640xf32> -> vector<32x640xf32>
    %c0_31 = arith.constant 0 : index
    %c0_32 = arith.constant 0 : index
    %57 = vector.load %arg3[%c0_31, %c0_32] : memref<32x640xf32, #tpu.memory_space<vmem>>, vector<32x640xf32>
    tpu.vector_store %arg3[%c0_31, %c0_32], %56 {strides = array<i32>} : memref<32x640xf32, #tpu.memory_space<vmem>>, vector<32x640xf32>,
    return
  }
  func.func @transform_0(%arg0: i32) -> (i32, i32) {
    %c0_i32 = arith.constant 0 : i32
    %c0_i32_0 = arith.constant 0 : i32
    %c0_i32_1 = arith.constant 0 : i32
    return %c0_i32, %c0_i32_0 : i32, i32
  }
  func.func @transform_1(%arg0: i32) -> (i32, i32) {
    %c0_i32 = arith.constant 0 : i32
    %c0_i32_0 = arith.constant 0 : i32
    return %arg0, %c0_i32 : i32, i32
  }
  func.func @transform_2(%arg0: i32) -> (i32, i32) {
    %c0_i32 = arith.constant 0 : i32
    %c0_i32_0 = arith.constant 0 : i32
    return %arg0, %c0_i32 : i32, i32
  }
}

</mosaic_0001>

<bundles_post_ra>
// kernel: tpu_custom_call.1
= control target key start
LH: loop header
LB: loop body
LE: loop exit
PB: predicated region body
PF: predicated region fallthrough
CT: control target
= control target key end

     0   :  { %7 = vsyncpa [#allocation4], 0  ;;  %s3390_s0 = inlined_call_operand.hbm [shape: bf16[640,640], index: 0, kind: input, shape index: {}]   ;;  %s3391_s1 = inlined_call_operand.hbm [shape: f32[32,128], index: 1, kind: input, shape index: {}]   ;;  %s3392_s2 = inlined_call_operand.hbm [shape: f32[32,640], index: 2, kind: output, shape index: {}]  }
   0x1   :  { %8 = vsyncpa [#allocation7], 0 }
   0x2   :  { %9 = vsyncpa [#allocation5], 0  ;;  %s14_s11 = sshll.u32 %s3390_s0, 4  ;;  %s3185_s12 = smov [#allocation3]   ;;  %s15_s11 = int_to_ptr.hbm [resolvable:$true] %s14_s11 }
   0x3   :  { %s16_s13 = sshll.u32 %s3185_s12, 4  ;;  %s27_s16 = sshll.u32 %s3391_s1, 4  ;;  %s17_s13 = int_to_ptr.vmem [resolvable:$true] %s16_s13  ;;  %s28_s16 = int_to_ptr.hbm [resolvable:$true] %s27_s16 }
   0x4   :  { %s3186_s17 = smov 320   ;;  %s3187_s18 = smov 20  }
   0x5   :  { %22 = dma.hbm_to_vmem [thread:$0]  %s15_s11, 25600, %s17_s13, [#allocation4], %s3186_s17, %s3186_s17, %s3187_s18  }
   0x6   :  { %s3188_s19 = smov [#allocation6]   ;;  %s3189_s21 = smov 128  }
   0x7   :  { %s29_s20 = sshll.u32 %s3188_s19, 4  ;;  %s3190_s22 = smov 8   ;;  %s30_s20 = int_to_ptr.vmem [resolvable:$true] %s29_s20 }
   0x8   :  { %35 = dma.hbm_to_vmem [thread:$0]  %s28_s16, 512, %s30_s20, [#allocation7], %s3189_s21, %s3189_s21, %s3190_s22  }
   0x9   :  { %3179 = dma.done.wait [#allocation4], 25600  }
   0xa   :  { %3180 = vsyncadd [#allocation4], 4294941696 }
   0xb   :  { %3181 = dma.done.wait [#allocation7], 512  }
   0xc   :  { %3182 = vsyncadd [#allocation7], 4294966784  ;;  %v2221_v0 = vld [vmem:[#allocation3 + $0x118] sm:$0xf]  ;;  %v2926_v1 = vld [vmem:[#allocation3 + $0x128] sm:$0xf0] }
   0xd   :  { %v2381_v2 = vld [vmem:[#allocation3 + $0x258] sm:$0xf]  ;;  %v2222_v3 = vor.u32 %v2926_v1, %v2221_v0  ;;  %v2966_v4 = vld [vmem:[#allocation3 + $0x268] sm:$0xf0]  ;;  %v2201_v9 = vld [vmem:[#allocation3 + $0xf0] sm:$0xf] }
   0xe   :  { %v2541_v5 = vld [vmem:[#allocation3 + $0x398] sm:$0xf]  ;;  %v3006_v6 = vld [vmem:[#allocation3 + $0x3a8] sm:$0xf0]  ;;  %v2382_v7 = vor.u32 %v2966_v4, %v2381_v2  ;;  %v2921_v10 = vld [vmem:[#allocation3 + $0x100] sm:$0xf0] }
   0xf   :  { %v2542_v8 = vor.u32 %v3006_v6, %v2541_v5  ;;  %v2361_v11 = vld [vmem:[#allocation3 + $0x230] sm:$0xf]  ;;  %1524 = vmatpush.bf16.msra.mxu0 %v2222_v3  ;;  %v2202_v12 = vor.u32 %v2921_v10, %v2201_v9  ;;  %v2961_v13 = vld [vmem:[#allocation3 + $0x240] sm:$0xf0]  ;;  %v2701_v18 = vld [vmem:[#allocation3 + $0x4d8] sm:$0xf] }
  0x10   :  { %v2521_v14 = vld [vmem:[#allocation3 + $0x370] sm:$0xf]  ;;  %v3001_v15 = vld [vmem:[#allocation3 + $0x380] sm:$0xf0]  ;;  %1543 = vmatpush.bf16.msra.mxu1 %v2382_v7  ;;  %v2362_v16 = vor.u32 %v2961_v13, %v2361_v11  ;;  %v3046_v19 = vld [vmem:[#allocation3 + $0x4e8] sm:$0xf0] }
  0x11   :  { %1562 = vmatpush.bf16.msra.mxu2 %v2542_v8  ;;  %v2522_v17 = vor.u32 %v3001_v15, %v2521_v14  ;;  %v2181_v20 = vld [vmem:[#allocation3 + $0xc8] sm:$0xf]  ;;  %v2702_v21 = vor.u32 %v3046_v19, %v2701_v18  ;;  %v2916_v22 = vld [vmem:[#allocation3 + $0xd8] sm:$0xf0]  ;;  %v2681_v27 = vld [vmem:[#allocation3 + $0x4b0] sm:$0xf] }
  0x12   :  { %v2341_v23 = vld [vmem:[#allocation3 + $0x208] sm:$0xf]  ;;  %v2956_v24 = vld [vmem:[#allocation3 + $0x218] sm:$0xf0]  ;;  %v2182_v28 = vor.u32 %v2916_v22, %v2181_v20  ;;  %v3041_v29 = vld [vmem:[#allocation3 + $0x4c0] sm:$0xf0] }
  0x13   :  { %v2501_v25 = vld [vmem:[#allocation3 + $0x348] sm:$0xf]  ;;  %v2996_v26 = vld [vmem:[#allocation3 + $0x358] sm:$0xf0]  ;;  %1525 = vmatpush.bf16.msra.mxu0 %v2202_v12  ;;  %1581 = vmatpush.bf16.msra.mxu3 %v2702_v21  ;;  %v2161_v30 = vld [vmem:[#allocation3 + $0xa0] sm:$0xf]  ;;  %v2342_v32 = vor.u32 %v2956_v24, %v2341_v23  ;;  %v2682_v34 = vor.u32 %v3041_v29, %v2681_v27 }
  0x14   :  { %v2911_v31 = vld [vmem:[#allocation3 + $0xb0] sm:$0xf0]  ;;  %1544 = vmatpush.bf16.msra.mxu1 %v2362_v16  ;;  %v2502_v33 = vor.u32 %v2996_v26, %v2501_v25  ;;  %v2321_v35 = vld [vmem:[#allocation3 + $0x1e0] sm:$0xf]  ;;  %v2661_v39 = vld [vmem:[#allocation3 + $0x488] sm:$0xf] }
  0x15   :  { %1563 = vmatpush.bf16.msra.mxu2 %v2522_v17  ;;  %v2951_v36 = vld [vmem:[#allocation3 + $0x1f0] sm:$0xf0]  ;;  %v2481_v37 = vld [vmem:[#allocation3 + $0x320] sm:$0xf]  ;;  %v3036_v40 = vld [vmem:[#allocation3 + $0x498] sm:$0xf0]  ;;  %v2162_v41 = vor.u32 %v2911_v31, %v2161_v30 }
  0x16   :  { %v2991_v38 = vld [vmem:[#allocation3 + $0x330] sm:$0xf0]  ;;  %v2662_v42 = vor.u32 %v3036_v40, %v2661_v39  ;;  %v2141_v43 = vld [vmem:[#allocation3 + $0x78] sm:$0xf]  ;;  %v2906_v44 = vld [vmem:[#allocation3 + $0x88] sm:$0xf0]  ;;  %v2322_v45 = vor.u32 %v2951_v36, %v2321_v35 }
  0x17   :  { %1526 = vmatpush.bf16.msra.mxu0 %v2182_v28  ;;  %1582 = vmatpush.bf16.msra.mxu3 %v2682_v34  ;;  %v2482_v46 = vor.u32 %v2991_v38, %v2481_v37  ;;  %v2301_v47 = vld [vmem:[#allocation3 + $0x1b8] sm:$0xf]  ;;  %v2641_v48 = vld [vmem:[#allocation3 + $0x460] sm:$0xf]  ;;  %v3031_v49 = vld [vmem:[#allocation3 + $0x470] sm:$0xf0]  ;;  %v2142_v53 = vor.u32 %v2906_v44, %v2141_v43 }
  0x18   :  { %1545 = vmatpush.bf16.msra.mxu1 %v2342_v32  ;;  %v2946_v50 = vld [vmem:[#allocation3 + $0x1c8] sm:$0xf0]  ;;  %v2461_v51 = vld [vmem:[#allocation3 + $0x2f8] sm:$0xf]  ;;  %v2642_v54 = vor.u32 %v3031_v49, %v2641_v48  ;;  %v2121_v55 = vld [vmem:[#allocation3 + $0x50] sm:$0xf] }
  0x19   :  { %1564 = vmatpush.bf16.msra.mxu2 %v2502_v33  ;;  %v2986_v52 = vld [vmem:[#allocation3 + $0x308] sm:$0xf0]  ;;  %v2901_v56 = vld [vmem:[#allocation3 + $0x60] sm:$0xf0]  ;;  %v2302_v57 = vor.u32 %v2946_v50, %v2301_v47  ;;  %v2281_v59 = vld [vmem:[#allocation3 + $0x190] sm:$0xf] }
  0x1a   :  { %v2462_v58 = vor.u32 %v2986_v52, %v2461_v51  ;;  %v2621_v60 = vld [vmem:[#allocation3 + $0x438] sm:$0xf]  ;;  %v3026_v61 = vld [vmem:[#allocation3 + $0x448] sm:$0xf0]  ;;  %v2941_v62 = vld [vmem:[#allocation3 + $0x1a0] sm:$0xf0]  ;;  %v2122_v3 = vor.u32 %v2901_v56, %v2121_v55 }
  0x1b   :  { %1527 = vmatpush.bf16.msra.mxu0 %v2162_v41  ;;  %1583 = vmatpush.bf16.msra.mxu3 %v2662_v42  ;;  %v2441_v63 = vld [vmem:[#allocation3 + $0x2d0] sm:$0xf]  ;;  %v2981_v0 = vld [vmem:[#allocation3 + $0x2e0] sm:$0xf0]  ;;  %v2101_v1 = vld [vmem:[#allocation3 + $0x28] sm:$0xf]  ;;  %v2622_v4 = vor.u32 %v3026_v61, %v2621_v60  ;;  %v2282_v8 = vor.u32 %v2941_v62, %v2281_v59 }
  0x1c   :  { %1546 = vmatpush.bf16.msra.mxu1 %v2322_v45  ;;  %v2896_v2 = vld [vmem:[#allocation3 + $0x38] sm:$0xf0]  ;;  %v2261_v5 = vld [vmem:[#allocation3 + $0x168] sm:$0xf]  ;;  %v2442_v9 = vor.u32 %v2981_v0, %v2441_v63  ;;  %v2601_v10 = vld [vmem:[#allocation3 + $0x410] sm:$0xf] }
  0x1d   :  { %1565 = vmatpush.bf16.msra.mxu2 %v2482_v46  ;;  %v2936_v6 = vld [vmem:[#allocation3 + $0x178] sm:$0xf0]  ;;  %v2421_v7 = vld [vmem:[#allocation3 + $0x2a8] sm:$0xf]  ;;  %v3021_v11 = vld [vmem:[#allocation3 + $0x420] sm:$0xf0]  ;;  %v2102_v15 = vor.u32 %v2896_v2, %v2101_v1 }
  0x1e   :  { %v3216_v12 = vld [vmem:[#allocation6] sm:$0xff]  ;;  %v2976_v13 = vld [vmem:[#allocation3 + $0x2b8] sm:$0xf0]  ;;  %v3218_v14 = vld [vmem:[#allocation6 + $0x8] sm:$0xff]  ;;  %v3191_v18 = vmov 0.0   ;;  %v2602_v20 = vor.u32 %v3021_v11, %v2601_v10  ;;  %v2262_v29 = vor.u32 %v2936_v6, %v2261_v5  ;;  %s3192_s0 = smov [#allocation8]  }
  0x1f   :  { %1528 = vmatpush.bf16.msra.mxu0 %v2142_v53  ;;  %1584 = vmatpush.bf16.msra.mxu3 %v2642_v54  ;;  %vm52_vm0 = vcmp.ge.f32.partialorder %v3216_v12, 0.9999  ;;  %v2081_v16 = vld [vmem:[#allocation3] sm:$0xf]  ;;  %v2891_v17 = vld [vmem:[#allocation3 + $0x10] sm:$0xf0]  ;;  %v2422_v30 = vor.u32 %v2976_v13, %v2421_v7 }
  0x20   :  { %1547 = vmatpush.bf16.msra.mxu1 %v2302_v57  ;;  %vm53_vm1 = vcmp.ge.f32.partialorder %v3218_v14, 0.9999  ;;  %v56_v19 = vsel %vm52_vm0, 1.0, %v3191_v18  ;;  %v2241_v21 = vld [vmem:[#allocation3 + $0x140] sm:$0xf]  ;;  %v2082_v41 = vor.u32 %v2891_v17, %v2081_v16  ;;  %s2023_s1 = sshll.u32 %s3192_s0, 4  ;;  %s2024_s1 = int_to_ptr.vmem [resolvable:$true] %s2023_s1 }
  0x21   :  { %1566 = vmatpush.bf16.msra.mxu2 %v2462_v58  ;;  %v2931_v22 = vld [vmem:[#allocation3 + $0x150] sm:$0xf0]  ;;  %v2401_v23 = vld [vmem:[#allocation3 + $0x280] sm:$0xf]  ;;  %v2581_v25 = vld [vmem:[#allocation3 + $0x3e8] sm:$0xf]  ;;  %v68_v28 = vpack.c.bf16 %v56_v19, %v56_v19 }
  0x22   :  { %v2971_v24 = vld [vmem:[#allocation3 + $0x290] sm:$0xf0]  ;;  %v57_v26 = vsel %vm53_vm1, 1.0, %v3191_v18  ;;  %v60_v27 = vmul.f32 0.9999, %v56_v19  ;;  %v2242_v47 = vor.u32 %v2931_v22, %v2241_v21  ;;  %s2025_s25 = sshll.u32 %s3392_s2, 4  ;;  %s2026_s25 = int_to_ptr.hbm [resolvable:$true] %s2025_s25 }
  0x23   :  { %1529 = vmatpush.bf16.msra.mxu0 %v2122_v3  ;;  %1585 = vmatpush.bf16.msra.mxu3 %v2622_v4  ;;  %v3016_v31 = vld [vmem:[#allocation3 + $0x3f8] sm:$0xf0]  ;;  %v61_v32 = vmul.f32 0.9999, %v57_v26  ;;  %v69_v33 = vpack.c.bf16 %v57_v26, %v57_v26  ;;  %v2861_v34 = vld [vmem:[#allocation3 + $0x618] sm:$0xf]  ;;  %v2402_v48 = vor.u32 %v2971_v24, %v2401_v23 }
  0x24   :  { %1548 = vmatpush.bf16.msra.mxu1 %v2282_v8  ;;  %v64_v35 = vsub.f32 %v3216_v12, %v60_v27  ;;  %72 = vst [vmem:[#allocation2] sm:$0xf] %v68_v28  ;;  %v3086_v36 = vld [vmem:[#allocation3 + $0x628] sm:$0xf0]  ;;  %v2924_v37 = vld [vmem:[#allocation3 + $0x11c] sm:$0xf]  ;;  %v2582_v42 = vor.u32 %v3016_v31, %v2581_v25 }
  0x25   :  { %1567 = vmatpush.bf16.msra.mxu2 %v2442_v9  ;;  %v65_v38 = vsub.f32 %v3218_v14, %v61_v32  ;;  %73 = vst [vmem:[#allocation2 + $0x14] sm:$0xf] %v69_v33  ;;  %v2223_v39 = vld [vmem:[#allocation3 + $0x12c] sm:$0xf0]  ;;  %v2964_v40 = vld [vmem:[#allocation3 + $0x25c] sm:$0xf]  ;;  %v2862_v54 = vor.u32 %v3086_v36, %v2861_v34 }
  0x26   :  { %v76_v43 = vadd.f32 %v64_v35, %v3216_v12  ;;  %v2383_v44 = vld [vmem:[#allocation3 + $0x26c] sm:$0xf0]  ;;  %v2561_v45 = vld [vmem:[#allocation3 + $0x3c0] sm:$0xf]  ;;  %v3011_v46 = vld [vmem:[#allocation3 + $0x3d0] sm:$0xf0]  ;;  %v2226_v55 = vor.u32 %v2924_v37, %v2223_v39 }
  0x27   :  { %1530 = vmatpush.bf16.msra.mxu0 %v2102_v15  ;;  %1586 = vmatpush.bf16.msra.mxu3 %v2602_v20  ;;  %v77_v49 = vadd.f32 %v65_v38, %v3218_v14  ;;  %v2841_v50 = vld [vmem:[#allocation3 + $0x5f0] sm:$0xf]  ;;  %v3081_v51 = vld [vmem:[#allocation3 + $0x600] sm:$0xf0]  ;;  %v2919_v52 = vld [vmem:[#allocation3 + $0xf4] sm:$0xf]  ;;  %v2386_v59 = vor.u32 %v2964_v40, %v2383_v44  ;;  %v2562_v0 = vor.u32 %v3011_v46, %v2561_v45 }
  0x28   :  { %1549 = vmatpush.bf16.msra.mxu1 %v2262_v29  ;;  %v2203_v53 = vld [vmem:[#allocation3 + $0x104] sm:$0xf0]  ;;  %vm80_vm2 = vcmp.ge.f32.partialorder %v76_v43, 0.9999  ;;  %v3004_v56 = vld [vmem:[#allocation3 + $0x39c] sm:$0xf]  ;;  %v2842_v13 = vor.u32 %v3081_v51, %v2841_v50 }
  0x29   :  { %1568 = vmatpush.bf16.msra.mxu2 %v2422_v30  ;;  %v2543_v57 = vld [vmem:[#allocation3 + $0x3ac] sm:$0xf0]  ;;  %vm81_vm3 = vcmp.ge.f32.partialorder %v77_v49, 0.9999  ;;  %v84_v58 = vsel %vm80_vm2, 1.0, %v3191_v18  ;;  %v2206_v15 = vor.u32 %v2919_v52, %v2203_v53  ;;  %s3193_s26 = smov 640  }
  0x2a   :  { %v2959_v60 = vld [vmem:[#allocation3 + $0x234] sm:$0xf]  ;;  %v85_v61 = vsel %vm81_vm3, 1.0, %v3191_v18  ;;  %v88_v62 = vmul.f32 0.9999, %v84_v58  ;;  %v96_v63 = vpack.c.bf16 %v84_v58, %v84_v58  ;;  %v2546_v5 = vor.u32 %v3004_v56, %v2543_v57  ;;  %s3194_s27 = smov 40  }
  0x2b   :  { %1531 = vmatpush.bf16.msra.mxu0 %v2082_v41  ;;  %1587 = vmatpush.bf16.msra.mxu3 %v2582_v42  ;;  %v2363_v1 = vld [vmem:[#allocation3 + $0x244] sm:$0xf0]  ;;  %v2041_v2 = vld [vmem:[#allocation2] sm:$0xf]  ;;  %v89_v3 = vmul.f32 0.9999, %v85_v61  ;;  %v97_v4 = vpack.c.bf16 %v85_v61, %v85_v61 }
  0x2c   :  { %1550 = vmatpush.bf16.msra.mxu1 %v2242_v47  ;;  %v2821_v6 = vld [vmem:[#allocation3 + $0x5c8] sm:$0xf]  ;;  %v3076_v7 = vld [vmem:[#allocation3 + $0x5d8] sm:$0xf0]  ;;  %v2914_v8 = vld [vmem:[#allocation3 + $0xcc] sm:$0xf]  ;;  %v92_v11 = vsub.f32 %v76_v43, %v88_v62  ;;  %v2366_v20 = vor.u32 %v2959_v60, %v2363_v1 }
  0x2d   :  { %1569 = vmatpush.bf16.msra.mxu2 %v2402_v48  ;;  %v2183_v9 = vld [vmem:[#allocation3 + $0xdc] sm:$0xf0]  ;;  %v2881_v10 = vld [vmem:[#allocation2 + $0x10] sm:$0xf0]  ;;  %100 = vst [vmem:[#allocation2 + $0x4] sm:$0xf] %v96_v63  ;;  %v93_v19 = vsub.f32 %v77_v49, %v89_v3  ;;  %v2822_v33 = vor.u32 %v3076_v7, %v2821_v6 }
  0x2e   :  { %v2954_v16 = vld [vmem:[#allocation3 + $0x20c] sm:$0xf]  ;;  %v3230_v17 = vor.u32 %v2881_v10, %v2041_v2  ;;  %101 = vst [vmem:[#allocation2 + $0x18] sm:$0xf] %v97_v4  ;;  %v2343_v21 = vld [vmem:[#allocation3 + $0x21c] sm:$0xf0]  ;;  %v104_v23 = vadd.f32 %v92_v11, %v3216_v12  ;;  %v2186_v34 = vor.u32 %v2914_v8, %v2183_v9 }
  0x2f   :  { %1600 = vmatpush.bf16.msrb.mxu0 %v2862_v54  ;;  %v2999_v22 = vld [vmem:[#allocation3 + $0x374] sm:$0xf]  ;;  %1588 = vmatpush.bf16.msra.mxu3 %v2562_v0  ;;  %v2523_v24 = vld [vmem:[#allocation3 + $0x384] sm:$0xf0]  ;;  %v2801_v25 = vld [vmem:[#allocation3 + $0x5a0] sm:$0xf]  ;;  %v105_v28 = vadd.f32 %v93_v19, %v3218_v14  ;;  %v2346_v38 = vor.u32 %v2954_v16, %v2343_v21 }
  0x30   :  { %1619 = vmatpush.bf16.msrb.mxu1 %v2226_v55  ;;  %v3071_v26 = vld [vmem:[#allocation3 + $0x5b0] sm:$0xf0]  ;;  %1532 = vmatmul.bf16.vlgmr.msra.gmra.mxu0 %v3230_v17  ;;  %v2526_v29 = vor.u32 %v2999_v22, %v2523_v24  ;;  %v2909_v30 = vld [vmem:[#allocation3 + $0xa4] sm:$0xf]  ;;  %v2163_v31 = vld [vmem:[#allocation3 + $0xb4] sm:$0xf0] }
  0x31   :  { %1638 = vmatpush.bf16.msrb.mxu2 %v2386_v59  ;;  %v3233_v27 = vld [vmem:[#allocation6 + $0x10] sm:$0xff]  ;;  %v2949_v32 = vld [vmem:[#allocation3 + $0x1e4] sm:$0xf]  ;;  %vm108_vm4 = vcmp.ge.f32.partialorder %v104_v23, 0.9999  ;;  %v2802_v39 = vor.u32 %v3071_v26, %v2801_v25  ;;  %v3238_v41 = vld [vmem:[#allocation6 + $0x18] sm:$0xff]  ;;  %v2166_v45 = vor.u32 %v2909_v30, %v2163_v31 }
  0x32   :  { %v2323_v35 = vld [vmem:[#allocation3 + $0x1f4] sm:$0xf0]  ;;  %v2994_v36 = vld [vmem:[#allocation3 + $0x34c] sm:$0xf]  ;;  %vm109_vm5 = vcmp.ge.f32.partialorder %v105_v28, 0.9999 }
  0x33   :  { %1657 = vmatpush.bf16.msrb.mxu3 %v2546_v5  ;;  %1601 = vmatpush.bf16.msrb.mxu0 %v2842_v13  ;;  %v112_v37 = vsel %vm108_vm4, 1.0, %v3191_v18  ;;  %v2503_v40 = vld [vmem:[#allocation3 + $0x35c] sm:$0xf0]  ;;  %v113_v42 = vsel %vm109_vm5, 1.0, %v3191_v18  ;;  %vm54_vm6 = vcmp.ge.f32.partialorder %v3233_v27, 0.9999  ;;  %v2326_v52 = vor.u32 %v2949_v32, %v2323_v35 }
  0x34   :  { %1620 = vmatpush.bf16.msrb.mxu1 %v2206_v15  ;;  %v116_v43 = vmul.f32 0.9999, %v112_v37  ;;  %v124_v44 = vpack.c.bf16 %v112_v37, %v112_v37  ;;  %v2879_v46 = vld [vmem:[#allocation2 + $0x4] sm:$0xf]  ;;  %v117_v47 = vmul.f32 0.9999, %v113_v42  ;;  %v125_v48 = vpack.c.bf16 %v113_v42, %v113_v42 }
  0x35   :  { %1639 = vmatpush.bf16.msrb.mxu2 %v2366_v20  ;;  %v2506_v49 = vor.u32 %v2994_v36, %v2503_v40  ;;  %v2043_v50 = vld [vmem:[#allocation2 + $0x14] sm:$0xf0]  ;;  %vm55_vm7 = vcmp.ge.f32.partialorder %v3238_v41, 0.9999  ;;  %v58_v55 = vsel %vm54_vm6, 1.0, %v3191_v18 }
  0x36   :  { %v120_v51 = vsub.f32 %v104_v23, %v116_v43  ;;  %128 = vst [vmem:[#allocation2 + $0x8] sm:$0xf] %v124_v44  ;;  %v3243_v53 = vor.u32 %v2879_v46, %v2043_v50  ;;  %v121_v54 = vsub.f32 %v105_v28, %v117_v47  ;;  %v59_v56 = vsel %vm55_vm7, 1.0, %v3191_v18  ;;  %v2781_v57 = vld [vmem:[#allocation3 + $0x578] sm:$0xf] }
  0x37   :  { %1658 = vmatpush.bf16.msrb.mxu3 %v2526_v29  ;;  %1602 = vmatpush.bf16.msrb.mxu0 %v2822_v33  ;;  %129 = vst [vmem:[#allocation2 + $0x1c] sm:$0xf] %v125_v48  ;;  %v62_v59 = vmul.f32 0.9999, %v58_v55  ;;  %v63_v60 = vmul.f32 0.9999, %v59_v56  ;;  %v70_v61 = vpack.c.bf16 %v58_v55, %v58_v55  ;;  %v71_v0 = vpack.c.bf16 %v59_v56, %v59_v56 }
  0x38   :  { %1621 = vmatpush.bf16.msrb.mxu1 %v2186_v34  ;;  %v3248_v58 = vadd.f32 %v120_v51, %v3216_v12  ;;  %v3066_v62 = vld [vmem:[#allocation3 + $0x588] sm:$0xf0]  ;;  %v3252_v63 = vadd.f32 %v121_v54, %v3218_v14  ;;  %v2904_v2 = vld [vmem:[#allocation3 + $0x7c] sm:$0xf]  ;;  %v2143_v3 = vld [vmem:[#allocation3 + $0x8c] sm:$0xf0] }
  0x39   :  { %1640 = vmatpush.bf16.msrb.mxu2 %v2346_v38  ;;  %1551 = vmatmul.bf16.vlgmr.msra.gmra.mxu1 %v3243_v53  ;;  %v2782_v1 = vor.u32 %v3066_v62, %v2781_v57  ;;  %v2944_v4 = vld [vmem:[#allocation3 + $0x1bc] sm:$0xf]  ;;  %v66_v5 = vsub.f32 %v3233_v27, %v62_v59  ;;  %v67_v6 = vsub.f32 %v3238_v41, %v63_v60  ;;  %v2303_v7 = vld [vmem:[#allocation3 + $0x1cc] sm:$0xf0]  ;;  %v2989_v19 = vld [vmem:[#allocation3 + $0x324] sm:$0xf] }
  0x3a   :  { %vm136_vm8 = vcmp.ge.f32.partialorder %v3248_v58, 0.9999  ;;  %74 = vst [vmem:[#allocation2 + $0x28] sm:$0xf] %v70_v61  ;;  %vm137_vm9 = vcmp.ge.f32.partialorder %v3252_v63, 0.9999  ;;  %v2146_v9 = vor.u32 %v2904_v2, %v2143_v3  ;;  %v2306_v10 = vor.u32 %v2944_v4, %v2303_v7 }
  0x3b   :  { %1659 = vmatpush.bf16.msrb.mxu3 %v2506_v49  ;;  %1603 = vmatpush.bf16.msrb.mxu0 %v2802_v39  ;;  %v140_v8 = vsel %vm136_vm8, 1.0, %v3191_v18  ;;  %75 = vst [vmem:[#allocation2 + $0x3c] sm:$0xf] %v71_v0  ;;  %v141_v11 = vsel %vm137_vm9, 1.0, %v3191_v18  ;;  %v78_v16 = vadd.f32 %v66_v5, %v3233_v27  ;;  %v79_v23 = vadd.f32 %v67_v6, %v3238_v41  ;;  %v2483_v24 = vld [vmem:[#allocation3 + $0x334] sm:$0xf0] }
  0x3c   :  { %1622 = vmatpush.bf16.msrb.mxu1 %v2166_v45  ;;  %v3260_v13 = vmul.f32 0.9999, %v140_v8  ;;  %v152_v15 = vpack.c.bf16 %v140_v8, %v140_v8  ;;  %v3263_v21 = vmul.f32 0.9999, %v141_v11  ;;  %v153_v22 = vpack.c.bf16 %v141_v11, %v141_v11  ;;  %v2761_v33 = vld [vmem:[#allocation3 + $0x550] sm:$0xf] }
  0x3d   :  { %1641 = vmatpush.bf16.msrb.mxu2 %v2326_v52  ;;  %v2049_v20 = vld [vmem:[#allocation2 + $0x8] sm:$0xf]  ;;  %vm82_vm10 = vcmp.ge.f32.partialorder %v78_v16, 0.9999  ;;  %v2486_v26 = vor.u32 %v2989_v19, %v2483_v24  ;;  %vm83_vm11 = vcmp.ge.f32.partialorder %v79_v23, 0.9999 }
  0x3e   :  { %v2882_v25 = vld [vmem:[#allocation2 + $0x18] sm:$0xf0]  ;;  %156 = vst [vmem:[#allocation2 + $0xc] sm:$0xf] %v152_v15  ;;  %v86_v29 = vsel %vm82_vm10, 1.0, %v3191_v18  ;;  %v87_v30 = vsel %vm83_vm11, 1.0, %v3191_v18  ;;  %v148_v0 = vsub.f32 %v3248_v58, %v3260_v13  ;;  %v149_v4 = vsub.f32 %v3252_v63, %v3263_v21 }
  0x3f   :  { %1604 = vmatpush.bf16.msrb.mxu0 %v2782_v1  ;;  %v3266_v28 = vor.u32 %v2882_v25, %v2049_v20  ;;  %157 = vst [vmem:[#allocation2 + $0x20] sm:$0xf] %v153_v22  ;;  %v90_v31 = vmul.f32 0.9999, %v86_v29  ;;  %v98_v32 = vpack.c.bf16 %v86_v29, %v86_v29  ;;  %1660 = vmatpush.bf16.msrb.mxu3 %v2486_v26  ;;  %v91_v35 = vmul.f32 0.9999, %v87_v30 }
  0x40   :  { %1623 = vmatpush.bf16.msrb.mxu1 %v2146_v9  ;;  %v99_v36 = vpack.c.bf16 %v87_v30, %v87_v30  ;;  %v3061_v37 = vld [vmem:[#allocation3 + $0x560] sm:$0xf0]  ;;  %v2899_v42 = vld [vmem:[#allocation3 + $0x54] sm:$0xf]  ;;  %v2123_v45 = vld [vmem:[#allocation3 + $0x64] sm:$0xf0]  ;;  %v160_v63 = vadd.f32 %v148_v0, %v3216_v12  ;;  %v161_v25 = vadd.f32 %v149_v4, %v3218_v14 }
  0x41   :  { %1642 = vmatpush.bf16.msrb.mxu2 %v2306_v10  ;;  %v2061_v34 = vld [vmem:[#allocation2 + $0x28] sm:$0xf]  ;;  %v94_v39 = vsub.f32 %v78_v16, %v90_v31  ;;  %102 = vst [vmem:[#allocation2 + $0x2c] sm:$0xf] %v98_v32  ;;  %v2762_v40 = vor.u32 %v3061_v37, %v2761_v33  ;;  %v95_v44 = vsub.f32 %v79_v23, %v91_v35  ;;  %v2939_v46 = vld [vmem:[#allocation3 + $0x194] sm:$0xf] }
  0x42   :  { %1570 = vmatmul.bf16.vlgmr.msra.gmra.mxu2 %v3266_v28  ;;  %v2886_v38 = vld [vmem:[#allocation2 + $0x38] sm:$0xf0]  ;;  %103 = vst [vmem:[#allocation2 + $0x40] sm:$0xf] %v99_v36  ;;  %v2126_v48 = vor.u32 %v2899_v42, %v2123_v45  ;;  %v2283_v49 = vld [vmem:[#allocation3 + $0x1a4] sm:$0xf0] }
  0x43   :  { %v3271_v43 = vor.u32 %v2886_v38, %v2061_v34  ;;  %v106_v47 = vadd.f32 %v94_v39, %v3233_v27  ;;  %1605 = vmatpush.bf16.msrb.mxu0 %v2762_v40  ;;  %v2984_v50 = vld [vmem:[#allocation3 + $0x2fc] sm:$0xf]  ;;  %v2463_v51 = vld [vmem:[#allocation3 + $0x30c] sm:$0xf0]  ;;  %v107_v54 = vadd.f32 %v95_v44, %v3238_v41  ;;  %v2286_v55 = vor.u32 %v2939_v46, %v2283_v49  ;;  %v2741_v57 = vld [vmem:[#allocation3 + $0x528] sm:$0xf] }
  0x44   :  { %v2466_v56 = vor.u32 %v2984_v50, %v2463_v51  ;;  %v3056_v59 = vld [vmem:[#allocation3 + $0x538] sm:$0xf0]  ;;  %1624 = vmatpush.bf16.msrb.mxu1 %v2126_v48  ;;  %v2894_v62 = vld [vmem:[#allocation3 + $0x2c] sm:$0xf]  ;;  %v2103_v3 = vld [vmem:[#allocation3 + $0x3c] sm:$0xf0] }
  0x45   :  { %v2880_v52 = vld [vmem:[#allocation2 + $0xc] sm:$0xf]  ;;  %1537 = vmatmul.bf16.gmra.mxu0 %v3271_v43  ;;  %vm110_vm12 = vcmp.ge.f32.partialorder %v106_v47, 0.9999  ;;  %v2742_v61 = vor.u32 %v3056_v59, %v2741_v57  ;;  %vm111_vm13 = vcmp.ge.f32.partialorder %v107_v54, 0.9999  ;;  %1643 = vmatpush.bf16.msrb.mxu2 %v2286_v55  ;;  %v2106_v8 = vor.u32 %v2894_v62, %v2103_v3 }
  0x46   :  { %v2051_v60 = vld [vmem:[#allocation2 + $0x1c] sm:$0xf0]  ;;  %v114_v2 = vsel %vm110_vm12, 1.0, %v3191_v18  ;;  %1661 = vmatpush.bf16.msrb.mxu3 %v2466_v56  ;;  %v115_v5 = vsel %vm111_vm13, 1.0, %v3191_v18  ;;  %v2934_v9 = vld [vmem:[#allocation3 + $0x16c] sm:$0xf] }
  0x47   :  { %v3278_v1 = vor.u32 %v2880_v52, %v2051_v60  ;;  %v118_v6 = vmul.f32 0.9999, %v114_v2  ;;  %v126_v7 = vpack.c.bf16 %v114_v2, %v114_v2  ;;  %1606 = vmatpush.bf16.msrb.mxu0 %v2742_v61  ;;  %v119_v10 = vmul.f32 0.9999, %v115_v5  ;;  %v2263_v13 = vld [vmem:[#allocation3 + $0x17c] sm:$0xf0] }
  0x48   :  { %v2884_v58 = vld [vmem:[#allocation2 + $0x2c] sm:$0xf]  ;;  %v127_v11 = vpack.c.bf16 %v115_v5, %v115_v5  ;;  %1625 = vmatpush.bf16.msrb.mxu1 %v2106_v8  ;;  %v2266_v19 = vor.u32 %v2934_v9, %v2263_v13  ;;  %v2979_v20 = vld [vmem:[#allocation3 + $0x2d4] sm:$0xf]  ;;  %v2443_v23 = vld [vmem:[#allocation3 + $0x2e4] sm:$0xf0] }
  0x49   :  { %1589 = vmatmul.bf16.vlgmr.msra.gmra.mxu3 %v3278_v1  ;;  %v2063_v15 = vld [vmem:[#allocation2 + $0x3c] sm:$0xf0]  ;;  %v122_v16 = vsub.f32 %v106_v47, %v118_v6  ;;  %130 = vst [vmem:[#allocation2 + $0x30] sm:$0xf] %v126_v7  ;;  %v123_v22 = vsub.f32 %v107_v54, %v119_v10  ;;  %v2721_v24 = vld [vmem:[#allocation3 + $0x500] sm:$0xf]  ;;  %v2446_v29 = vor.u32 %v2979_v20, %v2443_v23 }
  0x4a   :  { %v3286_v21 = vor.u32 %v2884_v58, %v2063_v15  ;;  %131 = vst [vmem:[#allocation2 + $0x44] sm:$0xf] %v127_v11  ;;  %1644 = vmatpush.bf16.msrb.mxu2 %v2266_v19  ;;  %v3051_v30 = vld [vmem:[#allocation3 + $0x510] sm:$0xf0]  ;;  %v2889_v31 = vld [vmem:[#allocation3 + $0x4] sm:$0xf] }
  0x4b   :  { %v3290_v26 = vadd.f32 %v122_v16, %v3233_v27  ;;  %v2083_v32 = vld [vmem:[#allocation3 + $0x14] sm:$0xf0]  ;;  %v3294_v12 = vadd.f32 %v123_v22, %v3238_v41  ;;  %v2722_v33 = vor.u32 %v3051_v30, %v2721_v24  ;;  %v2929_v35 = vld [vmem:[#allocation3 + $0x144] sm:$0xf]  ;;  %v2974_v37 = vld [vmem:[#allocation3 + $0x2ac] sm:$0xf]  ;;  %1662 = vmatpush.bf16.msrb.mxu3 %v2446_v29 }
  0x4c   :  { %1556 = vmatmul.bf16.gmra.mxu1 %v3286_v21  ;;  %v2086_v34 = vor.u32 %v2889_v31, %v2083_v32  ;;  %v2243_v36 = vld [vmem:[#allocation3 + $0x154] sm:$0xf0]  ;;  %v2423_v38 = vld [vmem:[#allocation3 + $0x2bc] sm:$0xf0]  ;;  %vm164_vm15 = vcmp.ge.f32.partialorder %v160_v63, 0.9999 }
  0x4d   :  { %vm138_vm14 = vcmp.ge.f32.partialorder %v3290_v26, 0.9999  ;;  %v2246_v14 = vor.u32 %v2929_v35, %v2243_v36  ;;  %vm139_vm0 = vcmp.ge.f32.partialorder %v3294_v12, 0.9999  ;;  %1607 = vmatpush.bf16.msrb.mxu0 %v2722_v33  ;;  %v2426_v40 = vor.u32 %v2974_v37, %v2423_v38  ;;  %v3044_v47 = vld [vmem:[#allocation3 + $0x4dc] sm:$0xf] }
  0x4e   :  { %v142_v39 = vsel %vm138_vm14, 1.0, %v3191_v18  ;;  %1626 = vmatpush.bf16.msrb.mxu1 %v2086_v34  ;;  %vm165_vm1 = vcmp.ge.f32.partialorder %v161_v25, 0.9999  ;;  %v143_v42 = vsel %vm139_vm0, 1.0, %v3191_v18  ;;  %v168_v46 = vsel %vm164_vm15, 1.0, %v3191_v18 }
  0x4f   :  { %v146_v44 = vmul.f32 0.9999, %v142_v39  ;;  %v154_v45 = vpack.c.bf16 %v142_v39, %v142_v39  ;;  %1645 = vmatpush.bf16.msrb.mxu2 %v2246_v14  ;;  %v147_v49 = vmul.f32 0.9999, %v143_v42  ;;  %v155_v50 = vpack.c.bf16 %v143_v42, %v143_v42  ;;  %1663 = vmatpush.bf16.msrb.mxu3 %v2426_v40  ;;  %v2703_v56 = vld [vmem:[#allocation3 + $0x4ec] sm:$0xf0] }
  0x50   :  { %v2069_v48 = vld [vmem:[#allocation2 + $0x30] sm:$0xf]  ;;  %v169_v51 = vsel %vm165_vm1, 1.0, %v3191_v18  ;;  %v172_v52 = vpack.c.bf16 %v168_v46, %v168_v46  ;;  %v2706_v59 = vor.u32 %v3044_v47, %v2703_v56  ;;  %v3084_v60 = vld [vmem:[#allocation3 + $0x61c] sm:$0xf] }
  0x51   :  { %v2887_v54 = vld [vmem:[#allocation2 + $0x40] sm:$0xf0]  ;;  %158 = vst [vmem:[#allocation2 + $0x34] sm:$0xf] %v154_v45  ;;  %v173_v55 = vpack.c.bf16 %v169_v51, %v169_v51  ;;  %v2863_v61 = vld [vmem:[#allocation3 + $0x62c] sm:$0xf0]  ;;  %v150_v58 = vsub.f32 %v3290_v26, %v146_v44  ;;  %v151_v16 = vsub.f32 %v3294_v12, %v147_v49 }
  0x52   :  { %v3302_v57 = vor.u32 %v2887_v54, %v2069_v48  ;;  %159 = vst [vmem:[#allocation2 + $0x48] sm:$0xf] %v155_v50  ;;  %v2866_v62 = vor.u32 %v3084_v60, %v2863_v61  ;;  %v2229_v0 = vld [vmem:[#allocation3 + $0x120] sm:$0xf]  ;;  %v2927_v2 = vld [vmem:[#allocation3 + $0x130] sm:$0xf0]  ;;  %1676 = vmatpush.bf16.msra.mxu0 %v2706_v59 }
  0x53   :  { %176 = vst [vmem:[#allocation2 + $0x10] sm:$0xf] %v172_v52  ;;  %v2230_v3 = vor.u32 %v2927_v2, %v2229_v0  ;;  %v2969_v4 = vld [vmem:[#allocation3 + $0x284] sm:$0xf]  ;;  %v2403_v5 = vld [vmem:[#allocation3 + $0x294] sm:$0xf0]  ;;  %v162_v34 = vadd.f32 %v150_v58, %v3233_v27  ;;  %v163_v38 = vadd.f32 %v151_v16, %v3238_v41 }
  0x54   :  { %1575 = vmatmul.bf16.gmra.mxu2 %v3302_v57  ;;  %177 = vst [vmem:[#allocation2 + $0x24] sm:$0xf] %v173_v55  ;;  %1695 = vmatpush.bf16.msra.mxu1 %v2866_v62  ;;  %v2406_v6 = vor.u32 %v2969_v4, %v2403_v5  ;;  %v3039_v7 = vld [vmem:[#allocation3 + $0x4b4] sm:$0xf]  ;;  %v2683_v8 = vld [vmem:[#allocation3 + $0x4c4] sm:$0xf0] }
  0x55   :  { %v3079_v9 = vld [vmem:[#allocation3 + $0x5f4] sm:$0xf]  ;;  %1714 = vmatpush.bf16.msra.mxu2 %v2230_v3  ;;  %v2686_v10 = vor.u32 %v3039_v7, %v2683_v8  ;;  %v2843_v11 = vld [vmem:[#allocation3 + $0x604] sm:$0xf0]  ;;  %v2209_v13 = vld [vmem:[#allocation3 + $0xf8] sm:$0xf] }
  0x56   :  { %v2922_v15 = vld [vmem:[#allocation3 + $0x108] sm:$0xf0]  ;;  %1664 = vmatpush.bf16.msrb.mxu3 %v2406_v6  ;;  %v2846_v19 = vor.u32 %v3079_v9, %v2843_v11  ;;  %v2389_v63 = vld [vmem:[#allocation3 + $0x260] sm:$0xf]  ;;  %v2967_v22 = vld [vmem:[#allocation3 + $0x270] sm:$0xf0] }
  0x57   :  { %v2210_v20 = vor.u32 %v2922_v15, %v2209_v13  ;;  %v3034_v23 = vld [vmem:[#allocation3 + $0x48c] sm:$0xf]  ;;  %1677 = vmatpush.bf16.msra.mxu0 %v2686_v10  ;;  %v2390_v25 = vor.u32 %v2967_v22, %v2389_v63  ;;  %v2663_v29 = vld [vmem:[#allocation3 + $0x49c] sm:$0xf0]  ;;  %v2189_v33 = vld [vmem:[#allocation3 + $0xd0] sm:$0xf] }
  0x58   :  { %v2885_v24 = vld [vmem:[#allocation2 + $0x34] sm:$0xf]  ;;  %v3074_v30 = vld [vmem:[#allocation3 + $0x5cc] sm:$0xf]  ;;  %1696 = vmatpush.bf16.msra.mxu1 %v2846_v19  ;;  %v2666_v26 = vor.u32 %v3034_v23, %v2663_v29  ;;  %v2823_v32 = vld [vmem:[#allocation3 + $0x5dc] sm:$0xf0] }
  0x59   :  { %v2071_v31 = vld [vmem:[#allocation2 + $0x44] sm:$0xf0]  ;;  %1715 = vmatpush.bf16.msra.mxu2 %v2210_v20  ;;  %v2826_v36 = vor.u32 %v3074_v30, %v2823_v32  ;;  %v2917_v37 = vld [vmem:[#allocation3 + $0xe0] sm:$0xf0]  ;;  %v2962_v42 = vld [vmem:[#allocation3 + $0x248] sm:$0xf0] }
  0x5a   :  { %v3308_v35 = vor.u32 %v2885_v24, %v2071_v31  ;;  %v2057_v12 = vld [vmem:[#allocation2 + $0x10] sm:$0xf]  ;;  %1733 = vmatpush.bf16.msra.mxu3 %v2390_v25  ;;  %v2369_v14 = vld [vmem:[#allocation3 + $0x238] sm:$0xf]  ;;  %v2190_v40 = vor.u32 %v2917_v37, %v2189_v33  ;;  %v3029_v44 = vld [vmem:[#allocation3 + $0x464] sm:$0xf] }
  0x5b   :  { %v2883_v39 = vld [vmem:[#allocation2 + $0x20] sm:$0xf0]  ;;  %v2370_v27 = vor.u32 %v2962_v42, %v2369_v14  ;;  %v2643_v46 = vld [vmem:[#allocation3 + $0x474] sm:$0xf0]  ;;  %v3069_v47 = vld [vmem:[#allocation3 + $0x5a4] sm:$0xf]  ;;  %1678 = vmatpush.bf16.msra.mxu0 %v2666_v26 }
  0x5c   :  { %1594 = vmatmul.bf16.gmra.mxu3 %v3308_v35  ;;  %v3312_v45 = vor.u32 %v2883_v39, %v2057_v12  ;;  %1627 = vmatmul.bf16.vlgmr.msrb.gmra.mxu1 %v3230_v17  ;;  %v2803_v48 = vld [vmem:[#allocation3 + $0x5b4] sm:$0xf0]  ;;  %v2646_v49 = vor.u32 %v3029_v44, %v2643_v46  ;;  %v2169_v51 = vld [vmem:[#allocation3 + $0xa8] sm:$0xf]  ;;  %v2912_v41 = vld [vmem:[#allocation3 + $0xb8] sm:$0xf0] }
  0x5d   :  { %1697 = vmatpush.bf16.msra.mxu1 %v2826_v36  ;;  %v2806_v50 = vor.u32 %v3069_v47, %v2803_v48  ;;  %v2349_v52 = vld [vmem:[#allocation3 + $0x210] sm:$0xf]  ;;  %1716 = vmatpush.bf16.msra.mxu2 %v2190_v40  ;;  %v2170_v54 = vor.u32 %v2912_v41, %v2169_v51  ;;  %v2957_v55 = vld [vmem:[#allocation3 + $0x220] sm:$0xf0]  ;;  %vm166_vm2 = vcmp.ge.f32.partialorder %v162_v34, 0.9999 }
  0x5e   :  { %1608 = vmatmul.bf16.vlgmr.msrb.gmra.mxu0 %v3312_v45  ;;  %vm167_vm3 = vcmp.ge.f32.partialorder %v163_v38, 0.9999  ;;  %1734 = vmatpush.bf16.msra.mxu3 %v2370_v27  ;;  %v2350_v56 = vor.u32 %v2957_v55, %v2349_v52  ;;  %v170_v59 = vsel %vm166_vm2, 1.0, %v3191_v18  ;;  %v3024_v61 = vld [vmem:[#allocation3 + $0x43c] sm:$0xf] }
  0x5f   :  { %v171_v60 = vsel %vm167_vm3, 1.0, %v3191_v18  ;;  %v2623_v62 = vld [vmem:[#allocation3 + $0x44c] sm:$0xf0]  ;;  %v174_v0 = vpack.c.bf16 %v170_v59, %v170_v59  ;;  %v3064_v3 = vld [vmem:[#allocation3 + $0x57c] sm:$0xf]  ;;  %1679 = vmatpush.bf16.msra.mxu0 %v2646_v49 }
  0x60   :  { %v175_v2 = vpack.c.bf16 %v171_v60, %v171_v60  ;;  %v2783_v4 = vld [vmem:[#allocation3 + $0x58c] sm:$0xf0]  ;;  %v2149_v5 = vld [vmem:[#allocation3 + $0x80] sm:$0xf]  ;;  %v2626_v6 = vor.u32 %v3024_v61, %v2623_v62  ;;  %v2907_v8 = vld [vmem:[#allocation3 + $0x90] sm:$0xf0] }
  0x61   :  { %1698 = vmatpush.bf16.msra.mxu1 %v2806_v50  ;;  %v2786_v7 = vor.u32 %v3064_v3, %v2783_v4  ;;  %v2329_v9 = vld [vmem:[#allocation3 + $0x1e8] sm:$0xf]  ;;  %v2952_v58 = vld [vmem:[#allocation3 + $0x1f8] sm:$0xf0]  ;;  %1717 = vmatpush.bf16.msra.mxu2 %v2170_v54  ;;  %178 = vst [vmem:[#allocation2 + $0x38] sm:$0xf] %v174_v0  ;;  %v2150_v10 = vor.u32 %v2907_v8, %v2149_v5 }
  0x62   :  { %v3019_v11 = vld [vmem:[#allocation3 + $0x414] sm:$0xf]  ;;  %v2603_v13 = vld [vmem:[#allocation3 + $0x424] sm:$0xf0]  ;;  %1735 = vmatpush.bf16.msra.mxu3 %v2350_v56  ;;  %179 = vst [vmem:[#allocation2 + $0x4c] sm:$0xf] %v175_v2  ;;  %v2330_v18 = vor.u32 %v2952_v58, %v2329_v9 }
  0x63   :  { %v3059_v15 = vld [vmem:[#allocation3 + $0x554] sm:$0xf]  ;;  %v2763_v16 = vld [vmem:[#allocation3 + $0x564] sm:$0xf0]  ;;  %v2129_v19 = vld [vmem:[#allocation3 + $0x58] sm:$0xf]  ;;  %1680 = vmatpush.bf16.msra.mxu0 %v2626_v6  ;;  %v2606_v22 = vor.u32 %v3019_v11, %v2603_v13 }
  0x64   :  { %1646 = vmatmul.bf16.vlgmr.msrb.gmra.mxu2 %v3243_v53  ;;  %v2902_v20 = vld [vmem:[#allocation3 + $0x68] sm:$0xf0]  ;;  %v2309_v63 = vld [vmem:[#allocation3 + $0x1c0] sm:$0xf]  ;;  %v2766_v23 = vor.u32 %v3059_v15, %v2763_v16  ;;  %v2947_v24 = vld [vmem:[#allocation3 + $0x1d0] sm:$0xf0] }
  0x65   :  { %1699 = vmatpush.bf16.msra.mxu1 %v2786_v7  ;;  %v3014_v25 = vld [vmem:[#allocation3 + $0x3ec] sm:$0xf]  ;;  %1718 = vmatpush.bf16.msra.mxu2 %v2150_v10  ;;  %v2130_v29 = vor.u32 %v2902_v20, %v2129_v19  ;;  %v2583_v30 = vld [vmem:[#allocation3 + $0x3fc] sm:$0xf0]  ;;  %v2310_v32 = vor.u32 %v2947_v24, %v2309_v63  ;;  %v2109_v33 = vld [vmem:[#allocation3 + $0x30] sm:$0xf] }
  0x66   :  { %v3054_v31 = vld [vmem:[#allocation3 + $0x52c] sm:$0xf]  ;;  %v2743_v26 = vld [vmem:[#allocation3 + $0x53c] sm:$0xf0]  ;;  %1736 = vmatpush.bf16.msra.mxu3 %v2330_v18  ;;  %v2897_v34 = vld [vmem:[#allocation3 + $0x40] sm:$0xf0]  ;;  %v2586_v39 = vor.u32 %v3014_v25, %v2583_v30 }
  0x67   :  { %v2289_v12 = vld [vmem:[#allocation3 + $0x198] sm:$0xf]  ;;  %v2942_v36 = vld [vmem:[#allocation3 + $0x1a8] sm:$0xf0]  ;;  %v3009_v37 = vld [vmem:[#allocation3 + $0x3c4] sm:$0xf]  ;;  %1681 = vmatpush.bf16.msra.mxu0 %v2606_v22  ;;  %v2746_v40 = vor.u32 %v3054_v31, %v2743_v26  ;;  %v2110_v46 = vor.u32 %v2897_v34, %v2109_v33 }
  0x68   :  { %v2563_v14 = vld [vmem:[#allocation3 + $0x3d4] sm:$0xf0]  ;;  %v2077_v38 = vld [vmem:[#allocation2 + $0x38] sm:$0xf]  ;;  %v3049_v42 = vld [vmem:[#allocation3 + $0x504] sm:$0xf]  ;;  %v2290_v50 = vor.u32 %v2942_v36, %v2289_v12 }
  0x69   :  { %1700 = vmatpush.bf16.msra.mxu1 %v2766_v23  ;;  %v2723_v44 = vld [vmem:[#allocation3 + $0x514] sm:$0xf0]  ;;  %v2888_v27 = vld [vmem:[#allocation2 + $0x48] sm:$0xf0]  ;;  %1719 = vmatpush.bf16.msra.mxu2 %v2130_v29  ;;  %v2089_v47 = vld [vmem:[#allocation3 + $0x8] sm:$0xf]  ;;  %v2566_v59 = vor.u32 %v3009_v37, %v2563_v14 }
  0x6a   :  { %v2892_v48 = vld [vmem:[#allocation3 + $0x18] sm:$0xf0]  ;;  %v3319_v49 = vor.u32 %v2888_v27, %v2077_v38  ;;  %1737 = vmatpush.bf16.msra.mxu3 %v2310_v32  ;;  %v2269_v51 = vld [vmem:[#allocation3 + $0x170] sm:$0xf]  ;;  %v2549_v41 = vld [vmem:[#allocation3 + $0x3a0] sm:$0xf]  ;;  %v2726_v60 = vor.u32 %v3049_v42, %v2723_v44 }
  0x6b   :  { %v3007_v52 = vld [vmem:[#allocation3 + $0x3b0] sm:$0xf0]  ;;  %v2937_v54 = vld [vmem:[#allocation3 + $0x180] sm:$0xf0]  ;;  %v2709_v55 = vld [vmem:[#allocation3 + $0x4e0] sm:$0xf]  ;;  %1682 = vmatpush.bf16.msra.mxu0 %v2586_v39  ;;  %v2090_v61 = vor.u32 %v2892_v48, %v2089_v47 }
  0x6c   :  { %1665 = vmatmul.bf16.vlgmr.msrb.gmra.mxu3 %v3266_v28  ;;  %1632 = vmatmul.bf16.gmra.mxu1 %v3271_v43  ;;  %v3047_v56 = vld [vmem:[#allocation3 + $0x4f0] sm:$0xf0]  ;;  %v2550_v62 = vor.u32 %v3007_v52, %v2549_v41  ;;  %v2869_v0 = vld [vmem:[#allocation3 + $0x620] sm:$0xf]  ;;  %v2270_v3 = vor.u32 %v2937_v54, %v2269_v51  ;;  %v2249_v5 = vld [vmem:[#allocation3 + $0x148] sm:$0xf] }
  0x6d   :  { %1701 = vmatpush.bf16.msra.mxu1 %v2746_v40  ;;  %1720 = vmatpush.bf16.msra.mxu2 %v2110_v46  ;;  %v3087_v2 = vld [vmem:[#allocation3 + $0x630] sm:$0xf0]  ;;  %v2710_v4 = vor.u32 %v3047_v56, %v2709_v55  ;;  %v2529_v6 = vld [vmem:[#allocation3 + $0x378] sm:$0xf]  ;;  %v3002_v7 = vld [vmem:[#allocation3 + $0x388] sm:$0xf0] }
  0x6e   :  { %1613 = vmatmul.bf16.gmra.mxu0 %v3319_v49  ;;  %1738 = vmatpush.bf16.msra.mxu3 %v2290_v50  ;;  %v2932_v8 = vld [vmem:[#allocation3 + $0x158] sm:$0xf0]  ;;  %v2689_v9 = vld [vmem:[#allocation3 + $0x4b8] sm:$0xf]  ;;  %v3042_v58 = vld [vmem:[#allocation3 + $0x4c8] sm:$0xf0]  ;;  %v2870_v10 = vor.u32 %v3087_v2, %v2869_v0  ;;  %v2530_v18 = vor.u32 %v3002_v7, %v2529_v6 }
  0x6f   :  { %1683 = vmatpush.bf16.msra.mxu0 %v2566_v59  ;;  %v2925_v11 = vld [vmem:[#allocation3 + $0x124] sm:$0xf]  ;;  %v2231_v13 = vld [vmem:[#allocation3 + $0x134] sm:$0xf0]  ;;  %v3082_v16 = vld [vmem:[#allocation3 + $0x608] sm:$0xf0]  ;;  %v2250_v19 = vor.u32 %v2932_v8, %v2249_v5  ;;  %v2690_v20 = vor.u32 %v3042_v58, %v2689_v9 }
  0x70   :  { %v2849_v15 = vld [vmem:[#allocation3 + $0x5f8] sm:$0xf]  ;;  %v2509_v63 = vld [vmem:[#allocation3 + $0x350] sm:$0xf]  ;;  %v2997_v22 = vld [vmem:[#allocation3 + $0x360] sm:$0xf0]  ;;  %v2234_v23 = vor.u32 %v2925_v11, %v2231_v13 }
  0x71   :  { %1702 = vmatpush.bf16.msra.mxu1 %v2726_v60  ;;  %1721 = vmatpush.bf16.msra.mxu2 %v2090_v61  ;;  %v2669_v24 = vld [vmem:[#allocation3 + $0x490] sm:$0xf]  ;;  %v3037_v25 = vld [vmem:[#allocation3 + $0x4a0] sm:$0xf0]  ;;  %v2850_v29 = vor.u32 %v3082_v16, %v2849_v15  ;;  %v2510_v31 = vor.u32 %v2997_v22, %v2509_v63  ;;  %v2920_v32 = vld [vmem:[#allocation3 + $0xfc] sm:$0xf] }
  0x72   :  { %1739 = vmatpush.bf16.msra.mxu3 %v2270_v3  ;;  %v2829_v30 = vld [vmem:[#allocation3 + $0x5d0] sm:$0xf]  ;;  %v3077_v26 = vld [vmem:[#allocation3 + $0x5e0] sm:$0xf0]  ;;  %v2670_v34 = vor.u32 %v3037_v25, %v2669_v24  ;;  %v2489_v12 = vld [vmem:[#allocation3 + $0x328] sm:$0xf] }
  0x73   :  { %1752 = vmatpush.bf16.msrb.mxu0 %v2550_v62  ;;  %v2211_v33 = vld [vmem:[#allocation3 + $0x10c] sm:$0xf0]  ;;  %v2992_v36 = vld [vmem:[#allocation3 + $0x338] sm:$0xf0]  ;;  %v2649_v37 = vld [vmem:[#allocation3 + $0x468] sm:$0xf]  ;;  %v2830_v38 = vor.u32 %v3077_v26, %v2829_v30 }
  0x74   :  { %1651 = vmatmul.bf16.gmra.mxu2 %v3286_v21  ;;  %v3032_v14 = vld [vmem:[#allocation3 + $0x478] sm:$0xf0]  ;;  %v2214_v39 = vor.u32 %v2920_v32, %v2211_v33  ;;  %v2809_v40 = vld [vmem:[#allocation3 + $0x5a8] sm:$0xf]  ;;  %v2915_v44 = vld [vmem:[#allocation3 + $0xd4] sm:$0xf]  ;;  %v2490_v46 = vor.u32 %v2992_v36, %v2489_v12 }
  0x75   :  { %1771 = vmatpush.bf16.msrb.mxu1 %v2710_v4  ;;  %1790 = vmatpush.bf16.msrb.mxu2 %v2870_v10  ;;  %v3072_v42 = vld [vmem:[#allocation3 + $0x5b8] sm:$0xf0]  ;;  %v2191_v27 = vld [vmem:[#allocation3 + $0xe4] sm:$0xf0]  ;;  %v2650_v47 = vor.u32 %v3032_v14, %v2649_v37  ;;  %v2469_v48 = vld [vmem:[#allocation3 + $0x300] sm:$0xf] }
  0x76   :  { %1740 = vmatpush.bf16.msra.mxu3 %v2250_v19  ;;  %v2987_v50 = vld [vmem:[#allocation3 + $0x310] sm:$0xf0]  ;;  %v2629_v51 = vld [vmem:[#allocation3 + $0x440] sm:$0xf]  ;;  %v2810_v52 = vor.u32 %v3072_v42, %v2809_v40  ;;  %v2194_v54 = vor.u32 %v2915_v44, %v2191_v27  ;;  %v2910_v59 = vld [vmem:[#allocation3 + $0xac] sm:$0xf] }
  0x77   :  { %1753 = vmatpush.bf16.msrb.mxu0 %v2530_v18  ;;  %v3027_v41 = vld [vmem:[#allocation3 + $0x450] sm:$0xf0]  ;;  %v2789_v55 = vld [vmem:[#allocation3 + $0x580] sm:$0xf]  ;;  %v2470_v61 = vor.u32 %v2987_v50, %v2469_v48  ;;  %v2449_v0 = vld [vmem:[#allocation3 + $0x2d8] sm:$0xf] }
  0x78   :  { %v3067_v56 = vld [vmem:[#allocation3 + $0x590] sm:$0xf0]  ;;  %v2171_v60 = vld [vmem:[#allocation3 + $0xbc] sm:$0xf0]  ;;  %v2630_v62 = vor.u32 %v3027_v41, %v2629_v51  ;;  %v2982_v2 = vld [vmem:[#allocation3 + $0x2e8] sm:$0xf0] }
  0x79   :  { %1772 = vmatpush.bf16.msrb.mxu1 %v2690_v20  ;;  %1791 = vmatpush.bf16.msrb.mxu2 %v2850_v29  ;;  %v2609_v3 = vld [vmem:[#allocation3 + $0x418] sm:$0xf]  ;;  %v3022_v4 = vld [vmem:[#allocation3 + $0x428] sm:$0xf0]  ;;  %v2790_v5 = vor.u32 %v3067_v56, %v2789_v55  ;;  %v2174_v6 = vor.u32 %v2910_v59, %v2171_v60  ;;  %v2905_v9 = vld [vmem:[#allocation3 + $0x84] sm:$0xf]  ;;  %v2450_v10 = vor.u32 %v2982_v2, %v2449_v0 }
  0x7a   :  { %1809 = vmatpush.bf16.msrb.mxu3 %v2234_v23  ;;  %v2769_v7 = vld [vmem:[#allocation3 + $0x558] sm:$0xf]  ;;  %v3062_v8 = vld [vmem:[#allocation3 + $0x568] sm:$0xf0]  ;;  %v2610_v11 = vor.u32 %v3022_v4, %v2609_v3  ;;  %v2429_v13 = vld [vmem:[#allocation3 + $0x2b0] sm:$0xf] }
  0x7b   :  { %1754 = vmatpush.bf16.msrb.mxu0 %v2510_v31  ;;  %v2151_v58 = vld [vmem:[#allocation3 + $0x94] sm:$0xf0]  ;;  %v2977_v18 = vld [vmem:[#allocation3 + $0x2c0] sm:$0xf0]  ;;  %v2589_v15 = vld [vmem:[#allocation3 + $0x3f0] sm:$0xf]  ;;  %v2770_v19 = vor.u32 %v3062_v8, %v2769_v7 }
  0x7c   :  { %1670 = vmatmul.bf16.gmra.mxu3 %v3302_v57  ;;  %1703 = vmatmul.bf16.vlgmr.msra.gmra.mxu1 %v3312_v45  ;;  %v3017_v16 = vld [vmem:[#allocation3 + $0x400] sm:$0xf0]  ;;  %v2154_v20 = vor.u32 %v2905_v9, %v2151_v58  ;;  %v2749_v63 = vld [vmem:[#allocation3 + $0x530] sm:$0xf]  ;;  %v2900_v23 = vld [vmem:[#allocation3 + $0x5c] sm:$0xf]  ;;  %v2430_v25 = vor.u32 %v2977_v18, %v2429_v13 }
  0x7d   :  { %1773 = vmatpush.bf16.msrb.mxu1 %v2670_v34  ;;  %1792 = vmatpush.bf16.msrb.mxu2 %v2830_v38  ;;  %v3057_v22 = vld [vmem:[#allocation3 + $0x540] sm:$0xf0]  ;;  %v2131_v24 = vld [vmem:[#allocation3 + $0x6c] sm:$0xf0]  ;;  %v2590_v29 = vor.u32 %v3017_v16, %v2589_v15  ;;  %v2409_v30 = vld [vmem:[#allocation3 + $0x288] sm:$0xf] }
  0x7e   :  { %1810 = vmatpush.bf16.msrb.mxu3 %v2214_v39  ;;  %1684 = vmatmul.bf16.vlgmr.msra.gmra.mxu0 %v3278_v1  ;;  %v2972_v31 = vld [vmem:[#allocation3 + $0x298] sm:$0xf0]  ;;  %v2569_v26 = vld [vmem:[#allocation3 + $0x3c8] sm:$0xf]  ;;  %v2965_v34 = vld [vmem:[#allocation3 + $0x264] sm:$0xf]  ;;  %v2750_v12 = vor.u32 %v3057_v22, %v2749_v63  ;;  %v2134_v36 = vor.u32 %v2900_v23, %v2131_v24 }
  0x7f   :  { %1755 = vmatpush.bf16.msrb.mxu0 %v2490_v46  ;;  %v3012_v32 = vld [vmem:[#allocation3 + $0x3d8] sm:$0xf0]  ;;  %v2729_v33 = vld [vmem:[#allocation3 + $0x508] sm:$0xf]  ;;  %v2391_v37 = vld [vmem:[#allocation3 + $0x274] sm:$0xf0]  ;;  %v2410_v44 = vor.u32 %v2972_v31, %v2409_v30 }
  0x80   :  { %v3005_v14 = vld [vmem:[#allocation3 + $0x3a4] sm:$0xf]  ;;  %v2551_v38 = vld [vmem:[#allocation3 + $0x3b4] sm:$0xf0]  ;;  %v3052_v39 = vld [vmem:[#allocation3 + $0x518] sm:$0xf0]  ;;  %v2570_v27 = vor.u32 %v3012_v32, %v2569_v26  ;;  %v2394_v48 = vor.u32 %v2965_v34, %v2391_v37 }
  0x81   :  { %1774 = vmatpush.bf16.msrb.mxu1 %v2650_v47  ;;  %1793 = vmatpush.bf16.msrb.mxu2 %v2810_v52  ;;  %v2895_v40 = vld [vmem:[#allocation3 + $0x34] sm:$0xf]  ;;  %v2111_v42 = vld [vmem:[#allocation3 + $0x44] sm:$0xf0]  ;;  %v3045_v46 = vld [vmem:[#allocation3 + $0x4e4] sm:$0xf]  ;;  %v2554_v50 = vor.u32 %v3005_v14, %v2551_v38  ;;  %v2730_v41 = vor.u32 %v3052_v39, %v2729_v33 }
  0x82   :  { %1811 = vmatpush.bf16.msrb.mxu3 %v2194_v54  ;;  %v2711_v47 = vld [vmem:[#allocation3 + $0x4f4] sm:$0xf0]  ;;  %v2890_v51 = vld [vmem:[#allocation3 + $0xc] sm:$0xf]  ;;  %v2114_v52 = vor.u32 %v2895_v40, %v2111_v42  ;;  %v2091_v54 = vld [vmem:[#allocation3 + $0x1c] sm:$0xf0] }
  0x83   :  { %1756 = vmatpush.bf16.msrb.mxu0 %v2470_v61  ;;  %v2960_v55 = vld [vmem:[#allocation3 + $0x23c] sm:$0xf]  ;;  %v2371_v56 = vld [vmem:[#allocation3 + $0x24c] sm:$0xf0]  ;;  %v2714_v59 = vor.u32 %v3045_v46, %v2711_v47  ;;  %v3085_v2 = vld [vmem:[#allocation3 + $0x624] sm:$0xf] }
  0x84   :  { %1722 = vmatmul.bf16.vlgmr.msra.gmra.mxu2 %v3230_v17  ;;  %v3000_v60 = vld [vmem:[#allocation3 + $0x37c] sm:$0xf]  ;;  %v2531_v61 = vld [vmem:[#allocation3 + $0x38c] sm:$0xf0]  ;;  %v2871_v3 = vld [vmem:[#allocation3 + $0x634] sm:$0xf0]  ;;  %v2374_v4 = vor.u32 %v2960_v55, %v2371_v56 }
  0x85   :  { %1775 = vmatpush.bf16.msrb.mxu1 %v2630_v62  ;;  %1794 = vmatpush.bf16.msrb.mxu2 %v2790_v5  ;;  %v3040_v62 = vld [vmem:[#allocation3 + $0x4bc] sm:$0xf]  ;;  %v2691_v0 = vld [vmem:[#allocation3 + $0x4cc] sm:$0xf0]  ;;  %v2094_v5 = vor.u32 %v2890_v51, %v2091_v54  ;;  %v2955_v7 = vld [vmem:[#allocation3 + $0x214] sm:$0xf]  ;;  %v2874_v58 = vor.u32 %v3085_v2, %v2871_v3 }
  0x86   :  { %1812 = vmatpush.bf16.msrb.mxu3 %v2174_v6  ;;  %v2534_v6 = vor.u32 %v3000_v60, %v2531_v61  ;;  %v2351_v8 = vld [vmem:[#allocation3 + $0x224] sm:$0xf0]  ;;  %v2694_v9 = vor.u32 %v3040_v62, %v2691_v0  ;;  %v3035_v13 = vld [vmem:[#allocation3 + $0x494] sm:$0xf]  ;;  %v3080_v15 = vld [vmem:[#allocation3 + $0x5fc] sm:$0xf] }
  0x87   :  { %1757 = vmatpush.bf16.msrb.mxu0 %v2450_v10  ;;  %v2995_v10 = vld [vmem:[#allocation3 + $0x354] sm:$0xf]  ;;  %v2671_v18 = vld [vmem:[#allocation3 + $0x4a4] sm:$0xf0]  ;;  %v2851_v16 = vld [vmem:[#allocation3 + $0x60c] sm:$0xf0] }
  0x88   :  { %v2950_v63 = vld [vmem:[#allocation3 + $0x1ec] sm:$0xf]  ;;  %v2674_v22 = vor.u32 %v3035_v13, %v2671_v18  ;;  %v2854_v23 = vor.u32 %v3080_v15, %v2851_v16  ;;  %v2331_v24 = vld [vmem:[#allocation3 + $0x1fc] sm:$0xf0]  ;;  %v3075_v26 = vld [vmem:[#allocation3 + $0x5d4] sm:$0xf] }
  0x89   :  { %1776 = vmatpush.bf16.msrb.mxu1 %v2610_v11  ;;  %1795 = vmatpush.bf16.msrb.mxu2 %v2770_v19  ;;  %v2511_v11 = vld [vmem:[#allocation3 + $0x364] sm:$0xf0]  ;;  %v2354_v19 = vor.u32 %v2955_v7, %v2351_v8  ;;  %v3030_v30 = vld [vmem:[#allocation3 + $0x46c] sm:$0xf]  ;;  %v2651_v31 = vld [vmem:[#allocation3 + $0x47c] sm:$0xf0]  ;;  %v2334_v33 = vor.u32 %v2950_v63, %v2331_v24 }
  0x8a   :  { %1813 = vmatpush.bf16.msrb.mxu3 %v2154_v20  ;;  %v2514_v20 = vor.u32 %v2995_v10, %v2511_v11  ;;  %v2831_v32 = vld [vmem:[#allocation3 + $0x5e4] sm:$0xf0]  ;;  %v2311_v37 = vld [vmem:[#allocation3 + $0x1d4] sm:$0xf0]  ;;  %v2985_v14 = vld [vmem:[#allocation3 + $0x304] sm:$0xf] }
  0x8b   :  { %1758 = vmatpush.bf16.msrb.mxu0 %v2430_v25  ;;  %v2990_v25 = vld [vmem:[#allocation3 + $0x32c] sm:$0xf]  ;;  %v2471_v38 = vld [vmem:[#allocation3 + $0x314] sm:$0xf0]  ;;  %v2834_v39 = vor.u32 %v3075_v26, %v2831_v32  ;;  %v3025_v40 = vld [vmem:[#allocation3 + $0x444] sm:$0xf] }
  0x8c   :  { %1741 = vmatmul.bf16.vlgmr.msra.gmra.mxu3 %v3243_v53  ;;  %1708 = vmatmul.bf16.gmra.mxu1 %v3319_v49  ;;  %v2631_v42 = vld [vmem:[#allocation3 + $0x454] sm:$0xf0]  ;;  %v2474_v47 = vor.u32 %v2985_v14, %v2471_v38  ;;  %v2291_v51 = vld [vmem:[#allocation3 + $0x1ac] sm:$0xf0]  ;;  %v3020_v55 = vld [vmem:[#allocation3 + $0x41c] sm:$0xf] }
  0x8d   :  { %1777 = vmatpush.bf16.msrb.mxu1 %v2590_v29  ;;  %1796 = vmatpush.bf16.msrb.mxu2 %v2750_v12  ;;  %v2491_v29 = vld [vmem:[#allocation3 + $0x33c] sm:$0xf0]  ;;  %v2945_v12 = vld [vmem:[#allocation3 + $0x1c4] sm:$0xf]  ;;  %v2611_v56 = vld [vmem:[#allocation3 + $0x42c] sm:$0xf0] }
  0x8e   :  { %1814 = vmatpush.bf16.msrb.mxu3 %v2134_v36  ;;  %1689 = vmatmul.bf16.gmra.mxu0 %v3308_v35  ;;  %v2494_v34 = vor.u32 %v2990_v25, %v2491_v29  ;;  %v2654_v36 = vor.u32 %v3030_v30, %v2651_v31  ;;  %v2314_v46 = vor.u32 %v2945_v12, %v2311_v37  ;;  %v2791_v60 = vld [vmem:[#allocation3 + $0x594] sm:$0xf0]  ;;  %v2935_v0 = vld [vmem:[#allocation3 + $0x174] sm:$0xf]  ;;  %v2271_v3 = vld [vmem:[#allocation3 + $0x184] sm:$0xf0] }
  0x8f   :  { %1759 = vmatpush.bf16.msrb.mxu0 %v2410_v44  ;;  %v3070_v44 = vld [vmem:[#allocation3 + $0x5ac] sm:$0xf]  ;;  %v2614_v2 = vor.u32 %v3020_v55, %v2611_v56  ;;  %v3015_v7 = vld [vmem:[#allocation3 + $0x3f4] sm:$0xf]  ;;  %v2591_v8 = vld [vmem:[#allocation3 + $0x404] sm:$0xf0]  ;;  %v2274_v10 = vor.u32 %v2935_v0, %v2271_v3 }
  0x90   :  { %v2930_v13 = vld [vmem:[#allocation3 + $0x14c] sm:$0xf]  ;;  %v2251_v18 = vld [vmem:[#allocation3 + $0x15c] sm:$0xf0]  ;;  %v2594_v15 = vor.u32 %v3015_v7, %v2591_v8  ;;  %v2751_v24 = vld [vmem:[#allocation3 + $0x544] sm:$0xf0] }
  0x91   :  { %1778 = vmatpush.bf16.msrb.mxu1 %v2570_v27  ;;  %1797 = vmatpush.bf16.msrb.mxu2 %v2730_v41  ;;  %v2811_v27 = vld [vmem:[#allocation3 + $0x5bc] sm:$0xf0]  ;;  %v2980_v41 = vld [vmem:[#allocation3 + $0x2dc] sm:$0xf]  ;;  %v2970_v16 = vld [vmem:[#allocation3 + $0x28c] sm:$0xf]  ;;  %v2254_v31 = vor.u32 %v2930_v13, %v2251_v18 }
  0x92   :  { %1815 = vmatpush.bf16.msrb.mxu3 %v2114_v52  ;;  %v2451_v52 = vld [vmem:[#allocation3 + $0x2ec] sm:$0xf0]  ;;  %v2814_v54 = vor.u32 %v3070_v44, %v2811_v27  ;;  %v2237_v25 = vld [vmem:[#allocation3 + $0x128] sm:$0xf]  ;;  %v2928_v29 = vld [vmem:[#allocation3 + $0x138] sm:$0xf0] }
  0x93   :  { %1828 = vmatpush.bf16.msra.mxu0 %v2394_v48  ;;  %v2940_v48 = vld [vmem:[#allocation3 + $0x19c] sm:$0xf]  ;;  %v2454_v62 = vor.u32 %v2980_v41, %v2451_v52  ;;  %v2397_v30 = vld [vmem:[#allocation3 + $0x268] sm:$0xf]  ;;  %v2238_v37 = vor.u32 %v2928_v29, %v2237_v25  ;;  %v3050_v14 = vld [vmem:[#allocation3 + $0x50c] sm:$0xf] }
  0x94   :  { %1727 = vmatmul.bf16.gmra.mxu2 %v3271_v43  ;;  %v2294_v61 = vor.u32 %v2940_v48, %v2291_v51  ;;  %v2968_v32 = vld [vmem:[#allocation3 + $0x278] sm:$0xf0]  ;;  %v2923_v44 = vld [vmem:[#allocation3 + $0x110] sm:$0xf0]  ;;  %v2377_v27 = vld [vmem:[#allocation3 + $0x240] sm:$0xf] }
  0x95   :  { %1847 = vmatpush.bf16.msra.mxu1 %v2554_v50  ;;  %1866 = vmatpush.bf16.msra.mxu2 %v2714_v59  ;;  %v2634_v50 = vor.u32 %v3025_v40, %v2631_v42  ;;  %v3065_v59 = vld [vmem:[#allocation3 + $0x584] sm:$0xf]  ;;  %v2398_v38 = vor.u32 %v2968_v32, %v2397_v30  ;;  %v2731_v40 = vld [vmem:[#allocation3 + $0x51c] sm:$0xf0]  ;;  %v3003_v48 = vld [vmem:[#allocation3 + $0x390] sm:$0xf0] }
  0x96   :  { %1816 = vmatpush.bf16.msrb.mxu3 %v2094_v5  ;;  %v2431_v5 = vld [vmem:[#allocation3 + $0x2c4] sm:$0xf0]  ;;  %v2217_v42 = vld [vmem:[#allocation3 + $0x100] sm:$0xf]  ;;  %v3048_v51 = vld [vmem:[#allocation3 + $0x4f8] sm:$0xf0]  ;;  %v2734_v41 = vor.u32 %v3050_v14, %v2731_v40 }
  0x97   :  { %1829 = vmatpush.bf16.msra.mxu0 %v2374_v4  ;;  %v2975_v4 = vld [vmem:[#allocation3 + $0x2b4] sm:$0xf]  ;;  %v2218_v52 = vor.u32 %v2923_v44, %v2217_v42  ;;  %v2197_v55 = vld [vmem:[#allocation3 + $0xd8] sm:$0xf]  ;;  %v2918_v56 = vld [vmem:[#allocation3 + $0xe8] sm:$0xf0] }
  0x98   :  { %v2434_v11 = vor.u32 %v2975_v4, %v2431_v5  ;;  %v2517_v0 = vld [vmem:[#allocation3 + $0x358] sm:$0xf]  ;;  %v2697_v3 = vld [vmem:[#allocation3 + $0x4c0] sm:$0xf]  ;;  %v3043_v4 = vld [vmem:[#allocation3 + $0x4d0] sm:$0xf0] }
  0x99   :  { %1848 = vmatpush.bf16.msra.mxu1 %v2534_v6  ;;  %1867 = vmatpush.bf16.msra.mxu2 %v2694_v9  ;;  %v2794_v6 = vor.u32 %v3065_v59, %v2791_v60  ;;  %v3060_v9 = vld [vmem:[#allocation3 + $0x55c] sm:$0xf]  ;;  %v2177_v8 = vld [vmem:[#allocation3 + $0xb0] sm:$0xf]  ;;  %v2953_v18 = vld [vmem:[#allocation3 + $0x200] sm:$0xf0] }
  0x9a   :  { %1885 = vmatpush.bf16.msra.mxu3 %v2874_v58  ;;  %v2771_v58 = vld [vmem:[#allocation3 + $0x56c] sm:$0xf0]  ;;  %v2317_v29 = vld [vmem:[#allocation3 + $0x1c8] sm:$0xf]  ;;  %v2988_v32 = vld [vmem:[#allocation3 + $0x318] sm:$0xf0] }
  0x9b   :  { %1830 = vmatpush.bf16.msra.mxu0 %v2354_v19  ;;  %v2411_v19 = vld [vmem:[#allocation3 + $0x29c] sm:$0xf0]  ;;  %v2774_v63 = vor.u32 %v3060_v9, %v2771_v58  ;;  %v2913_v9 = vld [vmem:[#allocation3 + $0xc0] sm:$0xf0]  ;;  %v2337_v13 = vld [vmem:[#allocation3 + $0x1f0] sm:$0xf] }
  0x9c   :  { %1746 = vmatmul.bf16.gmra.mxu3 %v3286_v21  ;;  %1779 = vmatmul.bf16.vlgmr.msrb.gmra.mxu1 %v3278_v1  ;;  %v2414_v26 = vor.u32 %v2970_v16, %v2411_v19  ;;  %v2993_v16 = vld [vmem:[#allocation3 + $0x340] sm:$0xf0]  ;;  %v2178_v19 = vor.u32 %v2913_v9, %v2177_v8  ;;  %v2297_v40 = vld [vmem:[#allocation3 + $0x1a0] sm:$0xf]  ;;  %v2943_v44 = vld [vmem:[#allocation3 + $0x1b0] sm:$0xf0] }
  0x9d   :  { %1849 = vmatpush.bf16.msra.mxu1 %v2514_v20  ;;  %1868 = vmatpush.bf16.msra.mxu2 %v2674_v22  ;;  %v3010_v20 = vld [vmem:[#allocation3 + $0x3cc] sm:$0xf]  ;;  %v2571_v22 = vld [vmem:[#allocation3 + $0x3dc] sm:$0xf0] }
  0x9e   :  { %1886 = vmatpush.bf16.msra.mxu3 %v2854_v23  ;;  %1760 = vmatmul.bf16.vlgmr.msrb.gmra.mxu0 %v3266_v28  ;;  %v3055_v23 = vld [vmem:[#allocation3 + $0x534] sm:$0xf]  ;;  %v2574_v12 = vor.u32 %v3010_v20, %v2571_v22  ;;  %v2677_v20 = vld [vmem:[#allocation3 + $0x498] sm:$0xf]  ;;  %v2157_v22 = vld [vmem:[#allocation3 + $0x88] sm:$0xf] }
  0x9f   :  { %1831 = vmatpush.bf16.msra.mxu0 %v2334_v33  ;;  %v2557_v33 = vld [vmem:[#allocation3 + $0x3a8] sm:$0xf] }
  0xa1   :  { %1850 = vmatpush.bf16.msra.mxu1 %v2494_v34  ;;  %1869 = vmatpush.bf16.msra.mxu2 %v2654_v36  ;;  %v3008_v34 = vld [vmem:[#allocation3 + $0x3b8] sm:$0xf0]  ;;  %v2754_v36 = vor.u32 %v3055_v23, %v2751_v24  ;;  %v2338_v24 = vor.u32 %v2953_v18, %v2337_v13  ;;  %v2933_v13 = vld [vmem:[#allocation3 + $0x160] sm:$0xf0]  ;;  %v2417_v18 = vld [vmem:[#allocation3 + $0x290] sm:$0xf] }
  0xa2   :  { %1887 = vmatpush.bf16.msra.mxu3 %v2834_v39  ;;  %v2558_v39 = vor.u32 %v3008_v34, %v2557_v33  ;;  %v2908_v23 = vld [vmem:[#allocation3 + $0x98] sm:$0xf0]  ;;  %v2657_v34 = vld [vmem:[#allocation3 + $0x470] sm:$0xf] }
  0xa3   :  { %1832 = vmatpush.bf16.msra.mxu0 %v2314_v46  ;;  %v2963_v46 = vld [vmem:[#allocation3 + $0x250] sm:$0xf0]  ;;  %v2158_v33 = vor.u32 %v2908_v23, %v2157_v22  ;;  %v2877_v22 = vld [vmem:[#allocation3 + $0x628] sm:$0xf]  ;;  %v3088_v23 = vld [vmem:[#allocation3 + $0x638] sm:$0xf0] }
  0xa4   :  { %1798 = vmatmul.bf16.vlgmr.msrb.gmra.mxu2 %v3312_v45 }
  0xa5   :  { %1851 = vmatpush.bf16.msra.mxu1 %v2474_v47  ;;  %1870 = vmatpush.bf16.msra.mxu2 %v2634_v50  ;;  %v2537_v47 = vld [vmem:[#allocation3 + $0x380] sm:$0xf]  ;;  %v2717_v50 = vld [vmem:[#allocation3 + $0x4e8] sm:$0xf] }
  0xa6   :  { %1888 = vmatpush.bf16.msra.mxu3 %v2814_v54  ;;  %v2378_v54 = vor.u32 %v2963_v46, %v2377_v27  ;;  %v2538_v59 = vor.u32 %v3003_v48, %v2537_v47  ;;  %v2718_v60 = vor.u32 %v3048_v51, %v2717_v50  ;;  %v2457_v27 = vld [vmem:[#allocation3 + $0x2e0] sm:$0xf]  ;;  %v2983_v46 = vld [vmem:[#allocation3 + $0x2f0] sm:$0xf0]  ;;  %v2637_v50 = vld [vmem:[#allocation3 + $0x448] sm:$0xf] }
  0xa7   :  { %1833 = vmatpush.bf16.msra.mxu0 %v2294_v61  ;;  %v2357_v61 = vld [vmem:[#allocation3 + $0x218] sm:$0xf]  ;;  %v3028_v51 = vld [vmem:[#allocation3 + $0x458] sm:$0xf0] }
  0xa9   :  { %1852 = vmatpush.bf16.msra.mxu1 %v2454_v62  ;;  %1871 = vmatpush.bf16.msra.mxu2 %v2614_v2  ;;  %v2958_v62 = vld [vmem:[#allocation3 + $0x228] sm:$0xf0] }
  0xaa   :  { %1889 = vmatpush.bf16.msra.mxu3 %v2794_v6  ;;  %v2998_v2 = vld [vmem:[#allocation3 + $0x368] sm:$0xf0]  ;;  %v2198_v6 = vor.u32 %v2918_v56, %v2197_v55  ;;  %v2358_v7 = vor.u32 %v2958_v62, %v2357_v61  ;;  %v2458_v55 = vor.u32 %v2983_v46, %v2457_v27  ;;  %v2277_v56 = vld [vmem:[#allocation3 + $0x178] sm:$0xf]  ;;  %v2817_v46 = vld [vmem:[#allocation3 + $0x5b0] sm:$0xf] }
  0xab   :  { %1834 = vmatpush.bf16.msra.mxu0 %v2274_v10  ;;  %v2518_v10 = vor.u32 %v2998_v2, %v2517_v0  ;;  %v2437_v61 = vld [vmem:[#allocation3 + $0x2b8] sm:$0xf]  ;;  %v2978_v62 = vld [vmem:[#allocation3 + $0x2c8] sm:$0xf0] }
  0xac   :  { %1817 = vmatmul.bf16.vlgmr.msrb.gmra.mxu3 %v3230_v17  ;;  %1784 = vmatmul.bf16.gmra.mxu1 %v3308_v35  ;;  %v2438_v9 = vor.u32 %v2978_v62, %v2437_v61 }
  0xad   :  { %1853 = vmatpush.bf16.msra.mxu1 %v2434_v11  ;;  %1872 = vmatpush.bf16.msra.mxu2 %v2594_v15  ;;  %v3340_v5 = vpop.f32.mrf.mxu0  ;;  %v2698_v11 = vor.u32 %v3043_v4, %v2697_v3  ;;  %v2497_v15 = vld [vmem:[#allocation3 + $0x330] sm:$0xf]  ;;  %v2617_v3 = vld [vmem:[#allocation3 + $0x420] sm:$0xf]  ;;  %v3023_v4 = vld [vmem:[#allocation3 + $0x430] sm:$0xf0] }
  0xae   :  { %1890 = vmatpush.bf16.msra.mxu3 %v2774_v63  ;;  %1765 = vmatmul.bf16.gmra.mxu0 %v3302_v57  ;;  %v3038_v63 = vld [vmem:[#allocation3 + $0x4a8] sm:$0xf0]  ;;  %v2498_v25 = vor.u32 %v2993_v16, %v2497_v15  ;;  %v2973_v15 = vld [vmem:[#allocation3 + $0x2a0] sm:$0xf0] }
  0xaf   :  { %1835 = vmatpush.bf16.msra.mxu0 %v2254_v31  ;;  %v2678_v30 = vor.u32 %v3038_v63, %v2677_v20  ;;  %v2948_v31 = vld [vmem:[#allocation3 + $0x1d8] sm:$0xf0]  ;;  %v2597_v20 = vld [vmem:[#allocation3 + $0x3f8] sm:$0xf]  ;;  %v3018_v63 = vld [vmem:[#allocation3 + $0x408] sm:$0xf0] }
  0xb1   :  { %1854 = vmatpush.bf16.msra.mxu1 %v2414_v26  ;;  %1873 = vmatpush.bf16.msra.mxu2 %v2574_v12  ;;  %v2477_v26 = vld [vmem:[#allocation3 + $0x308] sm:$0xf]  ;;  %v3033_v12 = vld [vmem:[#allocation3 + $0x480] sm:$0xf0] }
  0xb2   :  { %1891 = vmatpush.bf16.msra.mxu3 %v2754_v36  ;;  %v2137_v36 = vld [vmem:[#allocation3 + $0x60] sm:$0xf]  ;;  %v2658_v42 = vor.u32 %v3033_v12, %v2657_v34  ;;  %v3083_v12 = vld [vmem:[#allocation3 + $0x610] sm:$0xf0] }
  0xb3   :  { %1904 = vmatpush.bf16.msrb.mxu0 %v2238_v37  ;;  %v2903_v37 = vld [vmem:[#allocation3 + $0x70] sm:$0xf0]  ;;  %v2857_v34 = vld [vmem:[#allocation3 + $0x600] sm:$0xf] }
  0xb4   :  { %1803 = vmatmul.bf16.gmra.mxu2 %v3319_v49  ;;  %v2138_v48 = vor.u32 %v2903_v37, %v2137_v36 }
  0xb5   :  { %1923 = vmatpush.bf16.msrb.mxu1 %v2398_v38  ;;  %1942 = vmatpush.bf16.msrb.mxu2 %v2558_v39  ;;  %v3347_v14 = vpop.f32.mrf.mxu0  ;;  %v2318_v38 = vor.u32 %v2948_v31, %v2317_v29  ;;  %v2478_v39 = vor.u32 %v2988_v32, %v2477_v26  ;;  %v2418_v29 = vor.u32 %v2973_v15, %v2417_v18  ;;  %v2577_v32 = vld [vmem:[#allocation3 + $0x3d0] sm:$0xf]  ;;  %v3053_v18 = vld [vmem:[#allocation3 + $0x520] sm:$0xf0] }
  0xb6   :  { %1892 = vmatpush.bf16.msra.mxu3 %v2734_v41  ;;  %v3343_v58 = vpop.f32.mrf.mxu1  ;;  %v2117_v41 = vld [vmem:[#allocation3 + $0x38] sm:$0xf]  ;;  %v2878_v26 = vor.u32 %v3088_v23, %v2877_v22 }
  0xb7   :  { %1905 = vmatpush.bf16.msrb.mxu0 %v2218_v52  ;;  %v2898_v52 = vld [vmem:[#allocation3 + $0x48] sm:$0xf0] }
  0xb8   :  { %v2118_v2 = vor.u32 %v2898_v52, %v2117_v41 }
  0xb9   :  { %1924 = vmatpush.bf16.msrb.mxu1 %v2378_v54  ;;  %1943 = vmatpush.bf16.msrb.mxu2 %v2538_v59  ;;  %v2298_v54 = vor.u32 %v2943_v44, %v2297_v40  ;;  %v2638_v59 = vor.u32 %v3028_v51, %v2637_v50  ;;  %v3078_v40 = vld [vmem:[#allocation3 + $0x5e8] sm:$0xf0]  ;;  %v1553_v51 = vadd.f32 %v3343_v58, %v3340_v5  ;;  %v2777_v5 = vld [vmem:[#allocation3 + $0x560] sm:$0xf]  ;;  %v3063_v58 = vld [vmem:[#allocation3 + $0x570] sm:$0xf0] }
  0xba   :  { %1961 = vmatpush.bf16.msrb.mxu3 %v2718_v60  ;;  %v2938_v60 = vld [vmem:[#allocation3 + $0x188] sm:$0xf0] }
  0xbb   :  { %1906 = vmatpush.bf16.msrb.mxu0 %v2198_v6  ;;  %v2097_v6 = vld [vmem:[#allocation3 + $0x10] sm:$0xf]  ;;  %v2278_v8 = vor.u32 %v2938_v60, %v2277_v56  ;;  %v3068_v56 = vld [vmem:[#allocation3 + $0x598] sm:$0xf0] }
  0xbc   :  { %1822 = vmatmul.bf16.gmra.mxu3 %v3271_v43  ;;  %1855 = vmatmul.bf16.vlgmr.msra.gmra.mxu1 %v3266_v28 }
  0xbd   :  { %1925 = vmatpush.bf16.msrb.mxu1 %v2358_v7  ;;  %1944 = vmatpush.bf16.msrb.mxu2 %v2518_v10  ;;  %v2893_v7 = vld [vmem:[#allocation3 + $0x20] sm:$0xf0]  ;;  %v2257_v10 = vld [vmem:[#allocation3 + $0x150] sm:$0xf] }
  0xbe   :  { %1962 = vmatpush.bf16.msrb.mxu3 %v2698_v11  ;;  %1836 = vmatmul.bf16.vlgmr.msra.gmra.mxu0 %v3243_v53  ;;  %v3350_v47 = vpop.f32.mrf.mxu1  ;;  %v2618_v11 = vor.u32 %v3023_v4, %v2617_v3 }
  0xbf   :  { %1907 = vmatpush.bf16.msrb.mxu0 %v2178_v19  ;;  %v2098_v19 = vor.u32 %v2893_v7, %v2097_v6  ;;  %v1555_v3 = vadd.f32 %v3350_v47, %v3347_v14  ;;  %v2778_v6 = vor.u32 %v3063_v58, %v2777_v5  ;;  %v2737_v47 = vld [vmem:[#allocation3 + $0x510] sm:$0xf] }
  0xc1   :  { %1926 = vmatpush.bf16.msrb.mxu1 %v2338_v24  ;;  %1945 = vmatpush.bf16.msrb.mxu2 %v2498_v25  ;;  %v2258_v25 = vor.u32 %v2933_v13, %v2257_v10 }
  0xc2   :  { %1963 = vmatpush.bf16.msrb.mxu3 %v2678_v30  ;;  %v3355_v16 = vpop.f32.mrf.mxu0  ;;  %v2598_v30 = vor.u32 %v3018_v63, %v2597_v20  ;;  %v2738_v20 = vor.u32 %v3053_v18, %v2737_v47 }
  0xc3   :  { %1908 = vmatpush.bf16.msrb.mxu0 %v2158_v33  ;;  %v3013_v33 = vld [vmem:[#allocation3 + $0x3e0] sm:$0xf0] }
  0xc4   :  { %1874 = vmatmul.bf16.vlgmr.msra.gmra.mxu2 %v3278_v1  ;;  %v2578_v37 = vor.u32 %v3013_v33, %v2577_v32 }
  0xc5   :  { %1927 = vmatpush.bf16.msrb.mxu1 %v2318_v38  ;;  %1946 = vmatpush.bf16.msrb.mxu2 %v2478_v39  ;;  %v3352_v0 = vpop.f32.mrf.mxu2  ;;  %v2858_v38 = vor.u32 %v3083_v12, %v2857_v34  ;;  %v2837_v39 = vld [vmem:[#allocation3 + $0x5d8] sm:$0xf] }
  0xc6   :  { %1964 = vmatpush.bf16.msrb.mxu3 %v2658_v42  ;;  %v2838_v27 = vor.u32 %v3078_v40, %v2837_v39 }
  0xc7   :  { %1909 = vmatpush.bf16.msrb.mxu0 %v2138_v48  ;;  %v3073_v48 = vld [vmem:[#allocation3 + $0x5c0] sm:$0xf0] }
  0xc8   :  { %v2818_v52 = vor.u32 %v3073_v48, %v2817_v46 }
  0xc9   :  { %1928 = vmatpush.bf16.msrb.mxu1 %v2298_v54  ;;  %1947 = vmatpush.bf16.msrb.mxu2 %v2458_v55  ;;  %v3357_v24 = vpop.f32.mrf.mxu1  ;;  %v1572_v54 = vadd.f32 %v3352_v0, %v1553_v51  ;;  %v2797_v55 = vld [vmem:[#allocation3 + $0x588] sm:$0xf] }
  0xca   :  { %1965 = vmatpush.bf16.msrb.mxu3 %v2638_v59  ;;  %v3362_v42 = vpop.f32.mrf.mxu0  ;;  %v2798_v62 = vor.u32 %v3068_v56, %v2797_v55 }
  0xcb   :  { %1910 = vmatpush.bf16.msrb.mxu0 %v2118_v2 }
  0xcc   :  { %v1590_v31 = vpop.f32.mrf.mxu3  ;;  %1893 = vmatmul.bf16.vlgmr.msra.gmra.mxu3 %v3312_v45  ;;  %1860 = vmatmul.bf16.gmra.mxu1 %v3302_v57 }
  0xcd   :  { %1929 = vmatpush.bf16.msrb.mxu1 %v2278_v8  ;;  %1948 = vmatpush.bf16.msrb.mxu2 %v2438_v9  ;;  %v1573_v36 = vpop.f32.mrf.mxu2  ;;  %v1591_v60 = vadd.f32 %v1590_v31, %v1572_v54  ;;  %v2757_v8 = vld [vmem:[#allocation3 + $0x538] sm:$0xf]  ;;  %v3058_v9 = vld [vmem:[#allocation3 + $0x548] sm:$0xf0] }
  0xce   :  { %1966 = vmatpush.bf16.msrb.mxu3 %v2618_v11  ;;  %1841 = vmatmul.bf16.gmra.mxu0 %v3286_v21  ;;  %v1574_v7 = vadd.f32 %v1573_v36, %v1555_v3 }
  0xcf   :  { %1911 = vmatpush.bf16.msrb.mxu0 %v2098_v19 }
  0xd1   :  { %1930 = vmatpush.bf16.msrb.mxu1 %v2258_v25  ;;  %1949 = vmatpush.bf16.msrb.mxu2 %v2418_v29  ;;  %v3364_v44 = vpop.f32.mrf.mxu1 }
  0xd2   :  { %1967 = vmatpush.bf16.msrb.mxu3 %v2598_v30 }
  0xd3   :  { %1980 = vmatpush.bf16.msra.mxu0 %v2878_v26 }
  0xd4   :  { %1879 = vmatmul.bf16.gmra.mxu2 %v3308_v35  ;;  %v1592_v50 = vpop.f32.mrf.mxu3 }
  0xd5   :  { %3089 = vmatpush.bf16.msra.mxu1 %v2878_v26  ;;  %v1593_v11 = vadd.f32 %v1592_v50, %v1574_v7 }
  0xd6   :  { %1968 = vmatpush.bf16.msrb.mxu3 %v2578_v37 }
  0xd7   :  { %1981 = vmatpush.bf16.msra.mxu0 %v2858_v38  ;;  %v1576_v41 = vpop.f32.mrf.mxu2 }
  0xd9   :  { %3090 = vmatpush.bf16.msra.mxu1 %v2858_v38  ;;  %v1628_v59 = vpop.f32.mrf.mxu1 }
  0xdb   :  { %1982 = vmatpush.bf16.msra.mxu0 %v2838_v27  ;;  %v1609_v61 = vpop.f32.mrf.mxu0 }
  0xdc   :  { %1898 = vmatmul.bf16.gmra.mxu3 %v3319_v49  ;;  %v1610_v2 = vadd.f32 %v1609_v61, %v1591_v60  ;;  %1931 = vmatmul.bf16.vlgmr.msrb.gmra.mxu1 %v3243_v53  ;;  %v2758_v53 = vor.u32 %v3058_v9, %v2757_v8 }
  0xdd   :  { %3091 = vmatpush.bf16.msra.mxu1 %v2838_v27 }
  0xde   :  { %1999 = vst [vmem:[#allocation8] sm:$0xff] %v1610_v2  ;;  %1912 = vmatmul.bf16.vlgmr.msrb.gmra.mxu0 %v3230_v17  ;;  %v1558_v17 = vadd.f32 %v3357_v24, %v3355_v16  ;;  %v1560_v16 = vadd.f32 %v3364_v44, %v3362_v42 }
  0xdf   :  { %1983 = vmatpush.bf16.msra.mxu0 %v2818_v52  ;;  %v1595_v0 = vpop.f32.mrf.mxu3  ;;  %v1578_v4 = vpop.f32.mrf.mxu2 }
  0xe0   :  { %v1577_v63 = vadd.f32 %v1576_v41, %v1558_v17  ;;  %v1579_v30 = vadd.f32 %v1578_v4, %v1560_v16 }
  0xe1   :  { %3092 = vmatpush.bf16.msra.mxu1 %v2818_v52  ;;  %v1630_v10 = vpop.f32.mrf.mxu1 }
  0xe2   :  { %v1596_v23 = vadd.f32 %v1595_v0, %v1577_v63 }
  0xe3   :  { %1984 = vmatpush.bf16.msra.mxu0 %v2798_v62  ;;  %v1611_v13 = vpop.f32.mrf.mxu0 }
  0xe4   :  { %1950 = vmatmul.bf16.vlgmr.msrb.gmra.mxu2 %v3266_v28  ;;  %v1612_v14 = vadd.f32 %v1611_v13, %v1593_v11 }
  0xe5   :  { %3093 = vmatpush.bf16.msra.mxu1 %v2798_v62 }
  0xe6   :  { %2004 = vst [vmem:[#allocation8 + $0x28] sm:$0xff] %v1612_v14 }
  0xe7   :  { %1985 = vmatpush.bf16.msra.mxu0 %v2778_v6  ;;  %v1597_v15 = vpop.f32.mrf.mxu3  ;;  %v1647_v19 = vpop.f32.mrf.mxu2 }
  0xe8   :  { %v1598_v26 = vadd.f32 %v1597_v15, %v1579_v30  ;;  %v1648_v12 = vadd.f32 %v1647_v19, %v1628_v59 }
  0xe9   :  { %3094 = vmatpush.bf16.msra.mxu1 %v2778_v6  ;;  %v1633_v22 = vpop.f32.mrf.mxu1 }
  0xeb   :  { %1986 = vmatpush.bf16.msra.mxu0 %v2758_v53  ;;  %v1614_v25 = vpop.f32.mrf.mxu0 }
  0xec   :  { %1969 = vmatmul.bf16.vlgmr.msrb.gmra.mxu3 %v3278_v1  ;;  %v1615_v28 = vadd.f32 %v1614_v25, %v1596_v23  ;;  %1936 = vmatmul.bf16.gmra.mxu1 %v3286_v21 }
  0xed   :  { %3095 = vmatpush.bf16.msra.mxu1 %v2758_v53 }
  0xee   :  { %2009 = vst [vmem:[#allocation8 + $0x50] sm:$0xff] %v1615_v28  ;;  %1917 = vmatmul.bf16.gmra.mxu0 %v3271_v43 }
  0xef   :  { %1987 = vmatpush.bf16.msra.mxu0 %v2738_v20  ;;  %v1666_v24 = vpop.f32.mrf.mxu3  ;;  %v1649_v29 = vpop.f32.mrf.mxu2 }
  0xf0   :  { %v1667_v36 = vadd.f32 %v1666_v24, %v1648_v12  ;;  %v1650_v42 = vadd.f32 %v1649_v29, %v1630_v10 }
  0xf1   :  { %3096 = vmatpush.bf16.msra.mxu1 %v2738_v20  ;;  %v1635_v31 = vpop.f32.mrf.mxu1 }
  0xf3   :  { %v1616_v32 = vpop.f32.mrf.mxu0 }
  0xf4   :  { %1955 = vmatmul.bf16.gmra.mxu2 %v3302_v57  ;;  %v1617_v33 = vadd.f32 %v1616_v32, %v1598_v26 }
  0xf6   :  { %2014 = vst [vmem:[#allocation8 + $0x78] sm:$0xff] %v1617_v33 }
  0xf7   :  { %v1668_v1 = vpop.f32.mrf.mxu3  ;;  %v1652_v34 = vpop.f32.mrf.mxu2 }
  0xf8   :  { %v1669_v44 = vadd.f32 %v1668_v1, %v1650_v42  ;;  %v1653_v41 = vadd.f32 %v1652_v34, %v1633_v22 }
  0xf9   :  { %v1704_v21 = vpop.f32.mrf.mxu1 }
  0xfb   :  { %v1685_v37 = vpop.f32.mrf.mxu0 }
  0xfc   :  { %1974 = vmatmul.bf16.gmra.mxu3 %v3308_v35  ;;  %v1686_v38 = vadd.f32 %v1685_v37, %v1667_v36  ;;  %1993 = vmatmul.bf16.vlgmr.msra.gmra.mxu1 %v3319_v49 }
  0xfe   :  { %v1705_v43 = vadd.f32 %v1704_v21, %v1686_v38  ;;  %1988 = vmatmul.bf16.vlgmr.msra.gmra.mxu0 %v3312_v45 }
  0xff   :  { %v1671_v39 = vpop.f32.mrf.mxu3  ;;  %v1654_v40 = vpop.f32.mrf.mxu2 }
 0x100   :  { %2000 = vst [vmem:[#allocation8 + $0x8] sm:$0xff] %v1705_v43  ;;  %v1672_v52 = vadd.f32 %v1671_v39, %v1653_v41  ;;  %v1655_v59 = vadd.f32 %v1654_v40, %v1635_v31 }
 0x101   :  { %v1706_v57 = vpop.f32.mrf.mxu1 }
 0x103   :  { %v1687_v27 = vpop.f32.mrf.mxu0 }
 0x104   :  { %v1688_v46 = vadd.f32 %v1687_v27, %v1669_v44 }
 0x106   :  { %v1707_v48 = vadd.f32 %v1706_v57, %v1688_v46 }
 0x107   :  { %v1673_v50 = vpop.f32.mrf.mxu3  ;;  %v1723_v51 = vpop.f32.mrf.mxu2 }
 0x108   :  { %2005 = vst [vmem:[#allocation8 + $0x30] sm:$0xff] %v1707_v48  ;;  %v1674_v61 = vadd.f32 %v1673_v50, %v1655_v59 }
 0x109   :  { %v1709_v35 = vpop.f32.mrf.mxu1 }
 0x10b   :  { %v1690_v54 = vpop.f32.mrf.mxu0 }
 0x10c   :  { %v1691_v49 = vadd.f32 %v1690_v54, %v1672_v52 }
 0x10e   :  { %v1710_v55 = vadd.f32 %v1709_v35, %v1691_v49 }
 0x10f   :  { %v1742_v56 = vpop.f32.mrf.mxu3  ;;  %v1725_v45 = vpop.f32.mrf.mxu2 }
 0x110   :  { %2010 = vst [vmem:[#allocation8 + $0x58] sm:$0xff] %v1710_v55  ;;  %v1743_v8 = vadd.f32 %v1742_v56, %v1723_v51 }
 0x111   :  { %v1711_v60 = vpop.f32.mrf.mxu1 }
 0x113   :  { %v1692_v62 = vpop.f32.mrf.mxu0 }
 0x114   :  { %v1693_v2 = vadd.f32 %v1692_v62, %v1674_v61 }
 0x116   :  { %v1712_v5 = vadd.f32 %v1711_v60, %v1693_v2 }
 0x117   :  { %v1744_v58 = vpop.f32.mrf.mxu3  ;;  %v1728_v3 = vpop.f32.mrf.mxu2 }
 0x118   :  { %2015 = vst [vmem:[#allocation8 + $0x80] sm:$0xff] %v1712_v5  ;;  %v1745_v47 = vadd.f32 %v1744_v58, %v1725_v45 }
 0x119   :  { %v1780_v0 = vpop.f32.mrf.mxu1 }
 0x11b   :  { %v1761_v4 = vpop.f32.mrf.mxu0 }
 0x11c   :  { %v1762_v10 = vadd.f32 %v1761_v4, %v1743_v8 }
 0x11e   :  { %v1781_v13 = vadd.f32 %v1780_v0, %v1762_v10 }
 0x11f   :  { %v1747_v6 = vpop.f32.mrf.mxu3  ;;  %v1730_v7 = vpop.f32.mrf.mxu2 }
 0x120   :  { %v1748_v23 = vadd.f32 %v1747_v6, %v1728_v3 }
 0x121   :  { %v1782_v9 = vpop.f32.mrf.mxu1 }
 0x123   :  { %v1763_v11 = vpop.f32.mrf.mxu0 }
 0x124   :  { %v1764_v15 = vadd.f32 %v1763_v11, %v1745_v47 }
 0x126   :  { %v1783_v20 = vadd.f32 %v1782_v9, %v1764_v15 }
 0x127   :  { %v1749_v53 = vpop.f32.mrf.mxu3  ;;  %v1799_v14 = vpop.f32.mrf.mxu2 }
 0x128   :  { %v1800_v18 = vadd.f32 %v1799_v14, %v1781_v13  ;;  %v1750_v26 = vadd.f32 %v1749_v53, %v1730_v7 }
 0x129   :  { %v1785_v17 = vpop.f32.mrf.mxu1 }
 0x12a   :  { %2001 = vst [vmem:[#allocation8 + $0x10] sm:$0xff] %v1800_v18 }
 0x12b   :  { %v1766_v19 = vpop.f32.mrf.mxu0 }
 0x12c   :  { %v1767_v16 = vadd.f32 %v1766_v19, %v1748_v23 }
 0x12e   :  { %v1786_v29 = vadd.f32 %v1785_v17, %v1767_v16 }
 0x12f   :  { %v1818_v63 = vpop.f32.mrf.mxu3  ;;  %v1801_v22 = vpop.f32.mrf.mxu2 }
 0x130   :  { %v1802_v25 = vadd.f32 %v1801_v22, %v1783_v20 }
 0x131   :  { %v1787_v28 = vpop.f32.mrf.mxu1 }
 0x132   :  { %2006 = vst [vmem:[#allocation8 + $0x38] sm:$0xff] %v1802_v25 }
 0x133   :  { %v1768_v24 = vpop.f32.mrf.mxu0 }
 0x134   :  { %v1769_v1 = vadd.f32 %v1768_v24, %v1750_v26 }
 0x136   :  { %v1788_v12 = vadd.f32 %v1787_v28, %v1769_v1 }
 0x137   :  { %v1820_v30 = vpop.f32.mrf.mxu3  ;;  %v1804_v31 = vpop.f32.mrf.mxu2 }
 0x138   :  { %v1805_v32 = vadd.f32 %v1804_v31, %v1786_v29 }
 0x139   :  { %v1856_v33 = vpop.f32.mrf.mxu1 }
 0x13a   :  { %2011 = vst [vmem:[#allocation8 + $0x60] sm:$0xff] %v1805_v32 }
 0x13b   :  { %v1837_v34 = vpop.f32.mrf.mxu0 }
 0x13c   :  { %v1838_v42 = vadd.f32 %v1837_v34, %v1818_v63 }
 0x13e   :  { %v1857_v27 = vadd.f32 %v1856_v33, %v1838_v42 }
 0x13f   :  { %v1823_v21 = vpop.f32.mrf.mxu3  ;;  %v1806_v36 = vpop.f32.mrf.mxu2 }
 0x140   :  { %v1807_v37 = vadd.f32 %v1806_v36, %v1788_v12 }
 0x141   :  { %v1858_v38 = vpop.f32.mrf.mxu1 }
 0x142   :  { %2016 = vst [vmem:[#allocation8 + $0x88] sm:$0xff] %v1807_v37 }
 0x143   :  { %v1839_v43 = vpop.f32.mrf.mxu0 }
 0x144   :  { %v1840_v51 = vadd.f32 %v1839_v43, %v1820_v30 }
 0x146   :  { %v1859_v54 = vadd.f32 %v1858_v38, %v1840_v51 }
 0x147   :  { %v1825_v39 = vpop.f32.mrf.mxu3  ;;  %v1875_v40 = vpop.f32.mrf.mxu2 }
 0x148   :  { %v1876_v46 = vadd.f32 %v1875_v40, %v1857_v27 }
 0x149   :  { %v1861_v57 = vpop.f32.mrf.mxu1 }
 0x14b   :  { %v1842_v44 = vpop.f32.mrf.mxu0 }
 0x14c   :  { %v1843_v45 = vadd.f32 %v1842_v44, %v1823_v21 }
 0x14e   :  { %v1862_v62 = vadd.f32 %v1861_v57, %v1843_v45 }
 0x14f   :  { %v1894_v48 = vpop.f32.mrf.mxu3  ;;  %v1877_v50 = vpop.f32.mrf.mxu2 }
 0x150   :  { %v1895_v41 = vadd.f32 %v1894_v48, %v1876_v46  ;;  %v1878_v49 = vadd.f32 %v1877_v50, %v1859_v54 }
 0x151   :  { %v1863_v35 = vpop.f32.mrf.mxu1 }
 0x152   :  { %2002 = vst [vmem:[#allocation8 + $0x18] sm:$0xff] %v1895_v41 }
 0x153   :  { %v1844_v52 = vpop.f32.mrf.mxu0 }
 0x154   :  { %v1845_v3 = vadd.f32 %v1844_v52, %v1825_v39 }
 0x156   :  { %v1864_v7 = vadd.f32 %v1863_v35, %v1845_v3 }
 0x157   :  { %v1896_v55 = vpop.f32.mrf.mxu3  ;;  %v1880_v56 = vpop.f32.mrf.mxu2 }
 0x158   :  { %v1897_v59 = vadd.f32 %v1896_v55, %v1878_v49  ;;  %v1881_v2 = vadd.f32 %v1880_v56, %v1862_v62 }
 0x159   :  { %v1932_v60 = vpop.f32.mrf.mxu1 }
 0x15a   :  { %2007 = vst [vmem:[#allocation8 + $0x40] sm:$0xff] %v1897_v59 }
 0x15b   :  { %v1913_v61 = vpop.f32.mrf.mxu0 }
 0x15c   :  { %v1933_v15 = vadd.f32 %v1932_v60, %v1913_v61 }
 0x15f   :  { %v1899_v5 = vpop.f32.mrf.mxu3  ;;  %v1882_v58 = vpop.f32.mrf.mxu2 }
 0x160   :  { %v1900_v0 = vadd.f32 %v1899_v5, %v1881_v2  ;;  %v1883_v8 = vadd.f32 %v1882_v58, %v1864_v7 }
 0x161   :  { %v1934_v4 = vpop.f32.mrf.mxu1 }
 0x162   :  { %2012 = vst [vmem:[#allocation8 + $0x68] sm:$0xff] %v1900_v0 }
 0x163   :  { %v1915_v6 = vpop.f32.mrf.mxu0 }
 0x164   :  { %v1935_v24 = vadd.f32 %v1934_v4, %v1915_v6 }
 0x167   :  { %v1901_v9 = vpop.f32.mrf.mxu3  ;;  %v1951_v10 = vpop.f32.mrf.mxu2 }
 0x168   :  { %v1902_v11 = vadd.f32 %v1901_v9, %v1883_v8  ;;  %v1952_v20 = vadd.f32 %v1951_v10, %v1933_v15 }
 0x169   :  { %v1937_v13 = vpop.f32.mrf.mxu1 }
 0x16a   :  { %2017 = vst [vmem:[#allocation8 + $0x90] sm:$0xff] %v1902_v11 }
 0x16b   :  { %v1918_v53 = vpop.f32.mrf.mxu0 }
 0x16c   :  { %v1938_v25 = vadd.f32 %v1937_v13, %v1918_v53 }
 0x16f   :  { %v1970_v14 = vpop.f32.mrf.mxu3  ;;  %v1953_v47 = vpop.f32.mrf.mxu2 }
 0x170   :  { %v1971_v22 = vadd.f32 %v1970_v14, %v1952_v20  ;;  %v1954_v31 = vadd.f32 %v1953_v47, %v1935_v24 }
 0x171   :  { %v1939_v17 = vpop.f32.mrf.mxu1 }
 0x173   :  { %v1920_v18 = vpop.f32.mrf.mxu0 }
 0x174   :  { %v1940_v12 = vadd.f32 %v1939_v17, %v1920_v18 }
 0x177   :  { %v1972_v19 = vpop.f32.mrf.mxu3  ;;  %v1956_v63 = vpop.f32.mrf.mxu2 }
 0x178   :  { %v1957_v29 = vadd.f32 %v1956_v63, %v1938_v25  ;;  %v1973_v32 = vadd.f32 %v1972_v19, %v1954_v31 }
 0x179   :  { %v1994_v16 = vpop.f32.mrf.mxu1 }
 0x17b   :  { %v1989_v23 = vpop.f32.mrf.mxu0 }
 0x17c   :  { %v1990_v28 = vadd.f32 %v1989_v23, %v1971_v22 }
 0x17e   :  { %2003 = vst [vmem:[#allocation8 + $0x20] sm:$0xff] %v1990_v28 }
 0x17f   :  { %v1975_v30 = vpop.f32.mrf.mxu3  ;;  %v1958_v1 = vpop.f32.mrf.mxu2 }
 0x180   :  { %v1976_v26 = vadd.f32 %v1975_v30, %v1957_v29  ;;  %v1959_v36 = vadd.f32 %v1958_v1, %v1940_v12 }
 0x181   :  { %v1996_v38 = vpop.f32.mrf.mxu1 }
 0x182   :  { %v1995_v33 = vadd.f32 %v1994_v16, %v1976_v26 }
 0x183   :  { %v1991_v34 = vpop.f32.mrf.mxu0 }
 0x184   :  { %2013 = vst [vmem:[#allocation8 + $0x70] sm:$0xff] %v1995_v33  ;;  %v1992_v21 = vadd.f32 %v1991_v34, %v1973_v32 }
 0x186   :  { %2008 = vst [vmem:[#allocation8 + $0x48] sm:$0xff] %v1992_v21 }
 0x187   :  { %v1977_v37 = vpop.f32.mrf.mxu3 }
 0x188   :  { %v1978_v43 = vadd.f32 %v1977_v37, %v1959_v36 }
 0x18a   :  { %v1997_v39 = vadd.f32 %v1996_v38, %v1978_v43 }
 0x18c   :  { %2018 = vst [vmem:[#allocation8 + $0x98] sm:$0xff] %v1997_v39 }
 0x18d   :  { %2031 = dma.vmem_to_hbm [thread:$0]  %s2024_s1, 2560, %s2026_s25, [#allocation5], %s3193_s26, %s3193_s26, %s3194_s27  }
 0x18e   :  { %3183 = dma.done.wait [#allocation5], 2560  }
 0x18f   :  { %3184 = vsyncadd [#allocation5], 4294964736 }
 0x190   :  { %2036 = vsyncpa [#allocation4], 1 }
 0x191   :  { %2037 = vsyncpa [#allocation7], 1 }
 0x192   :  { %2038 = vsyncpa [#allocation5], 1 }

</bundles_post_ra>
